<compile_context>
chip_gen: v7x
topology: tpu7x:2x2x1
jax: 0.10.0
libtpu: 0.0.40
codegen_flags: <defaults>
</compile_context>

<pallas_src>
import jax
import jax.numpy as jnp
from jax.experimental import pallas as pl
from jax.experimental.pallas import tpu as pltpu


# ----------------------------------------------------------------------------
# Helpers
# ----------------------------------------------------------------------------
def _round_up(x, m):
    return (x + m - 1) // m * m


def _cdiv(a, b):
    return (a + b - 1) // b


def _bn_fold(bn, eps):
    """Eval-mode BN as per-channel (scale, bias)."""
    inv_std = 1.0 / jnp.sqrt(bn["var"] + eps)
    scale = bn["gamma"] * inv_std
    bias = bn["beta"] - bn["mean"] * scale
    return scale, bias


def _shift_views(x, kh, kw, stride, pad, h_e, w_q):
    """s*kw row/column-phase shifted, flattened views of the padded image.

    Returns (N, s*kw, h_e*w_q, C) where view (a*kw + j) holds
    x_pad[a + p*stride, j + q*stride] at flat row p*w_q + q.
    """
    n, h, w, c = x.shape
    s = stride
    h_need = h_e * s                       # max row index read: h_e*s - 1
    w_need = (w_q - 1) * s + kw            # max col index read: w_need - 1
    xp = jnp.pad(x, ((0, 0),
                     (pad, max(h_need - h - pad, 0)),
                     (pad, max(w_need - w - pad, 0)),
                     (0, 0)))
    views = []
    for a in range(s):
        for j in range(kw):
            v = xp[:, a:a + h_e * s:s, j:j + w_q * s:s, :]   # (N, h_e, w_q, C)
            views.append(v.reshape(n, h_e * w_q, c))
    return jnp.stack(views, axis=1)                           # (N, s*kw, L, C)


def _to_out_grid(t, w_q, mg_pad):
    """(N, Hout, Wout, C) -> bf16 flat (N, mg_pad, C) on the (Hout, w_q) grid."""
    n, ho, wo, c = t.shape
    if w_q > wo:
        t = jnp.pad(t, ((0, 0), (0, 0), (0, w_q - wo), (0, 0)))
    t = t.reshape(n, ho * w_q, c)
    if mg_pad > ho * w_q:
        t = jnp.pad(t, ((0, 0), (0, mg_pad - ho * w_q), (0, 0)))
    return t.astype(jnp.bfloat16)


# ----------------------------------------------------------------------------
# Pallas kernel: unrolled tap matmuls + bias (+ fused shortcut) (+ ReLU)
# ----------------------------------------------------------------------------
def _conv_kernel(taps, relu, has_shortcut):
    """taps: list of (shift-array index, static row offset) per KxK tap."""

    def kernel(*refs):
        if has_shortcut:
            xs_ref, w_ref, b_ref, xsc_ref, wsc_ref, bsc_ref, o_ref = refs
        else:
            xs_ref, w_ref, b_ref, o_ref = refs

        tm = o_ref.shape[1]
        base = pl.program_id(1) * tm          # tm % 16 == 0

        # Unrolled tap loop; first matmul initializes the f32 accumulator.
        acc = None
        for t, (src, off) in enumerate(taps):
            start = pl.multiple_of(base + off, 16)   # off % 16 == 0 by construction
            a = xs_ref[0, src, pl.ds(start, tm), :]  # (tm, cin) bf16, resident block
            part = jnp.dot(a, w_ref[t], preferred_element_type=jnp.float32)
            acc = part if acc is None else acc + part

        out = acc + b_ref[...]                       # BN bias (scale folded into W)
        if has_shortcut:
            # fused shortcut: 1x1-conv+BN projection OR identity (w_sc = I)
            out = out + (jnp.dot(xsc_ref[0], wsc_ref[...],
                                 preferred_element_type=jnp.float32)
                         + bsc_ref[...])
        if relu:
            out = jnp.maximum(out, 0.0)
        o_ref[0] = out.astype(o_ref.dtype)

    return kernel


# ----------------------------------------------------------------------------
# Fused conv + BN(eval) [+ residual] [+ ReLU]
# ----------------------------------------------------------------------------
def fused_conv_bn(x, w_hwio, bn, *, stride, relu, shortcut=None,
                  eps=1e-5, tile_m=512):
    """x: (N,H,W,Cin) NHWC.  w_hwio: (KH,KW,Cin,Cout).  bn: running stats.

    shortcut: None or (x_sc, w_sc, scale_sc, bias_sc) with x_sc of shape
    (N, Hout, Wout, Csc) already on this conv's output spatial grid; the
    residual  x_sc @ (w_sc * scale_sc) + bias_sc  is added before the ReLU
    (identity shortcut passes w_sc = I, scale = 1, bias = 0).
    Returns the conv output in bf16 NHWC.
    """
    n, h, w, cin = x.shape
    kh, kw, _, cout = w_hwio.shape
    s = stride
    pad = (kh - 1) // 2                                # 3x3 -> 1, 1x1 -> 0
    h_out = (h + 2 * pad - kh) // s + 1
    w_out = (w + 2 * pad - kw) // s + 1

    # Output-grid width rounded to 16 so every in-kernel row offset is a
    # multiple of 16 (bf16 sublane pairs); extra columns are sliced off.
    w_q = _round_up(w_out, 16)
    di_max = (kh - 1) // s
    h_e = h_out + di_max
    n_shift = s * kw
    n_taps = kh * kw

    # --- activations: bf16 shifted views (the only activation rearrangement) -
    x = x.astype(jnp.bfloat16)
    xs = _shift_views(x, kh, kw, s, pad, h_e, w_q)     # (N, S, h_e*w_q, cin)

    # tap (i, j) -> (shift-array index, static row offset inside that array)
    taps = [((i % s) * kw + j, (i // s) * w_q)
            for i in range(kh) for j in range(kw)]

    # --- weights: fold BN scale, pad Cout to a lane-dense multiple of 128 ----
    scale, bias = _bn_fold(bn, eps)
    coutp = _round_up(cout, 128)
    w2 = w_hwio.reshape(n_taps, cin, cout) * scale
    w2 = jnp.pad(w2, ((0, 0), (0, 0), (0, coutp - cout))).astype(jnp.bfloat16)
    bias2 = jnp.pad(bias, (0, coutp - cout)).reshape(1, coutp).astype(jnp.float32)

    # --- row tiling of the flat (Hout, w_q) output grid ------------------------
    mg = h_out * w_q
    nt = _cdiv(mg, tile_m)
    if n * nt < 2 and mg >= 32:            # keep both TensorCores busy (v7x)
        nt = 2
    tm = _round_up(_cdiv(mg, nt), 16)
    rt = _cdiv(mg, tm)
    mg_pad = rt * tm

    l_need = mg_pad + di_max * w_q
    if l_need > xs.shape[2]:
        xs = jnp.pad(xs, ((0, 0), (0, 0), (0, l_need - xs.shape[2]), (0, 0)))
    l_pad = xs.shape[2]

    inputs = [xs, w2, bias2]
    in_specs = [
        # whole per-image shifted-view stack: resident across all row tiles
        pl.BlockSpec((1, n_shift, l_pad, cin), lambda b, r: (b, 0, 0, 0)),
        # all taps' weights: resident across the whole grid
        pl.BlockSpec((n_taps, cin, coutp), lambda b, r: (0, 0, 0)),
        pl.BlockSpec((1, coutp), lambda b, r: (0, 0)),
    ]
    est = (2 * n_shift * l_pad * cin * 2 + 2 * n_taps * cin * coutp * 2
           + 2 * coutp * 4 + 2 * tm * coutp * 2)

    has_sc = shortcut is not None
    if has_sc:
        x_sc, w_sc, s_sc, b_sc = shortcut
        assert x_sc.shape[1:3] == (h_out, w_out), (x_sc.shape, h_out, w_out)
        csc = x_sc.shape[-1]
        x_sc_f = _to_out_grid(x_sc, w_q, mg_pad)       # (N, mg_pad, csc) bf16
        w_sc2 = jnp.pad(w_sc * s_sc,
                        ((0, 0), (0, coutp - cout))).astype(jnp.bfloat16)
        b_sc2 = jnp.pad(b_sc, (0, coutp - cout)).reshape(1, coutp).astype(jnp.float32)
        inputs += [x_sc_f, w_sc2, b_sc2]
        in_specs += [
            pl.BlockSpec((1, tm, csc), lambda b, r: (b, r, 0)),
            pl.BlockSpec((csc, coutp), lambda b, r: (0, 0)),
            pl.BlockSpec((1, coutp), lambda b, r: (0, 0)),
        ]
        est += 2 * tm * csc * 2 + 2 * csc * coutp * 2 + 2 * coutp * 4

    # v7x has 64 MiB physical VMEM -> cap the scoped limit at 48 MiB.
    vmem_limit = int(min(48 * 2**20, max(32 * 2**20, 2 * est)))

    out = pl.pallas_call(
        _conv_kernel(taps, relu, has_sc),
        out_shape=jax.ShapeDtypeStruct((n, mg_pad, coutp), jnp.bfloat16),
        grid=(n, rt),
        in_specs=in_specs,
        out_specs=pl.BlockSpec((1, tm, coutp), lambda b, r: (b, r, 0)),
        compiler_params=pltpu.CompilerParams(
            dimension_semantics=("parallel", "parallel"),
            vmem_limit_bytes=vmem_limit),
    )(*inputs)

    out = out[:, :mg, :cout].reshape(n, h_out, w_q, cout)[:, :, :w_out, :]
    return out                                          # bf16 NHWC


# ----------------------------------------------------------------------------
# BasicBlock forward (wrapper): NCHW in / NCHW out, like the PyTorch module
# ----------------------------------------------------------------------------
def basic_block_forward(x_nchw, params, in_planes, planes, stride, eps=1e-5):
    x = jnp.transpose(x_nchw, (0, 2, 3, 1)).astype(jnp.float32)   # NCHW -> NHWC

    out1 = fused_conv_bn(x, params["w1"], params["bn1"],
                         stride=stride, relu=True)                # bf16

    has_proj = (stride != 1) or (in_planes != planes)
    if has_proj:
        # 1x1 / stride-s projection shortcut: subsampled x, BN folded
        x_sc = x[:, ::stride, ::stride, :]
        s_sc, b_sc = _bn_fold(params["bn_sc"], eps)
        w_sc = params["w_sc"].reshape(in_planes, planes)
        shortcut = (x_sc, w_sc, s_sc, b_sc)
    else:
        # identity shortcut fused as a matmul against a padded identity matrix
        shortcut = (x, jnp.eye(planes, dtype=jnp.float32),
                    jnp.ones((planes,), jnp.float32),
                    jnp.zeros((planes,), jnp.float32))

    out2 = fused_conv_bn(out1, params["w2"], params["bn2"],
                         stride=1, relu=True, shortcut=shortcut)

    return jnp.transpose(out2.astype(jnp.float32), (0, 3, 1, 2))  # NHWC -> NCHW


# ----------------------------------------------------------------------------
# Deterministic parameter init (shapes implied by BasicBlock.__init__)
# ----------------------------------------------------------------------------
def init_basic_block_params(key, in_planes, planes, stride):
    def bn_params(c, kk):
        g, b, m, v = jax.random.split(kk, 4)
        return {
            "gamma": jax.random.uniform(g, (c,), jnp.float32, 0.5, 1.5),
            "beta": 0.1 * jax.random.normal(b, (c,), jnp.float32),
            "mean": 0.1 * jax.random.normal(m, (c,), jnp.float32),
            "var": jax.random.uniform(v, (c,), jnp.float32, 0.5, 1.5),
        }

    k1, k2, k3, kb1, kb2, kb3 = jax.random.split(key, 6)
    params = {
        "w1": 0.1 * jax.random.normal(k1, (3, 3, in_planes, planes), jnp.float32),
        "bn1": bn_params(planes, kb1),
        "w2": 0.1 * jax.random.normal(k2, (3, 3, planes, planes), jnp.float32),
        "bn2": bn_params(planes, kb2),
    }
    if stride != 1 or in_planes != planes:
        params["w_sc"] = 0.1 * jax.random.normal(
            k3, (1, 1, in_planes, planes), jnp.float32)
        params["bn_sc"] = bn_params(planes, kb3)
    return params


# ----------------------------------------------------------------------------
# Pure-JAX f32 reference (lax.conv) for correctness checking
# ----------------------------------------------------------------------------
def _conv_ref(x, w, stride, pad):
    return jax.lax.conv_general_dilated(
        x, w, window_strides=(stride, stride),
        padding=[(pad, pad), (pad, pad)],
        dimension_numbers=("NHWC", "HWIO", "NHWC"))


def _bn_ref(x, bn, eps=1e-5):
    return (x - bn["mean"]) / jnp.sqrt(bn["var"] + eps) * bn["gamma"] + bn["beta"]


def basic_block_reference(x_nchw, params, in_planes, planes, stride):
    x = jnp.transpose(x_nchw, (0, 2, 3, 1))
    out = jax.nn.relu(_bn_ref(_conv_ref(x, params["w1"], stride, 1), params["bn1"]))
    out = _bn_ref(_conv_ref(out, params["w2"], 1, 1), params["bn2"])
    if stride != 1 or in_planes != planes:
        sc = _bn_ref(_conv_ref(x, params["w_sc"], stride, 0), params["bn_sc"])
    else:
        sc = x
    out = jax.nn.relu(out + sc)
    return jnp.transpose(out, (0, 3, 1, 2))


if __name__ == "__main__":
    key = jax.random.PRNGKey(0)
    kx1, kp1, kx2, kp2 = jax.random.split(key, 4)

    fwd = jax.jit(basic_block_forward, static_argnums=(2, 3, 4))

    # Tolerances loosened vs. the f32 reference because MXU inputs are bf16.
    ATOL = RTOL = 5e-2

    # --- Config A: downsampling block (projection shortcut), stride=2 ---------
    N, in_planes, planes, H, W, stride = 2, 4, 8, 16, 16, 2
    x = jax.random.normal(kx1, (N, in_planes, H, W), jnp.float32)     # NCHW
    params = init_basic_block_params(kp1, in_planes, planes, stride)

    out = jax.block_until_ready(fwd(x, params, in_planes, planes, stride))
    assert out.shape == (N, planes, H // stride, W // stride), out.shape
    ref = jax.block_until_ready(
        basic_block_reference(x, params, in_planes, planes, stride))
    err = float(jnp.max(jnp.abs(out - ref)))
    assert jnp.allclose(out, ref, atol=ATOL, rtol=RTOL), err

    # --- Config B: identity shortcut, stride=1, in_planes == planes -----------
    N2, planes2, H2, W2 = 2, 8, 16, 16
    x2 = jax.random.normal(kx2, (N2, planes2, H2, W2), jnp.float32)
    params2 = init_basic_block_params(kp2, planes2, planes2, 1)

    out2 = jax.block_until_ready(fwd(x2, params2, planes2, planes2, 1))
    assert out2.shape == (N2, planes2, H2, W2), out2.shape
    ref2 = jax.block_until_ready(
        basic_block_reference(x2, params2, planes2, planes2, 1))
    err2 = float(jnp.max(jnp.abs(out2 - ref2)))
    assert jnp.allclose(out2, ref2, atol=ATOL, rtol=RTOL), err2

    print("KERNEL_OK")
</pallas_src>

<mosaic_0001>
module attributes {stable_mosaic.version = 11 : i64} {
  func.func @kernel(%arg0: i32, %arg1: i32, %arg2: memref<1x6x144x4xbf16, #tpu.memory_space<vmem>>, %arg3: memref<9x4x128xbf16, #tpu.memory_space<vmem>>, %arg4: memref<1x128xf32, #tpu.memory_space<vmem>>, %arg5: memref<1x128x128xbf16, #tpu.memory_space<vmem>>) attributes {dimension_semantics = [#tpu.dimension_semantics<parallel>, #tpu.dimension_semantics<parallel>], iteration_bounds = array<i64: 2, 1>, scalar_prefetch = 0 : i64, scratch_operands = 0 : i64, tpu.core_type = #tpu.core_type<tc>, window_params = [{transform_indices = @transform_0, window_bounds = array<i64: 1, 6, 144, 4>}, {pipeline_mode = #tpu.pipeline_mode<synchronous>, transform_indices = @transform_1, window_bounds = array<i64: 9, 4, 128>}, {pipeline_mode = #tpu.pipeline_mode<synchronous>, transform_indices = @transform_2, window_bounds = array<i64: 1, 128>}, {transform_indices = @transform_3, window_bounds = array<i64: 1, 128, 128>}]} {
    %c128_i32 = arith.constant 128 : i32
    %0 = arith.muli %arg1, %c128_i32 : i32
    %c0_i32 = arith.constant 0 : i32
    %1 = arith.addi %0, %c0_i32 : i32
    %2 = tpu.assume_multiple %1, 16 : i32
    %c0 = arith.constant 0 : index
    %c0_0 = arith.constant 0 : index
    %3 = arith.index_cast %2 : i32 to index
    %c0_1 = arith.constant 0 : index
    %4 = vector.load %arg2[%c0, %c0_0, %3, %c0_1] : memref<1x6x144x4xbf16, #tpu.memory_space<vmem>>, vector<1x1x128x4xbf16>
    %5 = vector.shape_cast %4 : vector<1x1x128x4xbf16> to vector<128x4xbf16>
    %c0_2 = arith.constant 0 : index
    %c0_3 = arith.constant 0 : index
    %c0_4 = arith.constant 0 : index
    %6 = vector.load %arg3[%c0_2, %c0_3, %c0_4] : memref<9x4x128xbf16, #tpu.memory_space<vmem>>, vector<1x4x128xbf16>
    %7 = vector.shape_cast %6 : vector<1x4x128xbf16> to vector<4x128xbf16>
    %cst = arith.constant dense<0.000000e+00> : vector<128x128xf32>
    %8 = tpu.matmul %5, %7, %cst {dimension_numbers = #tpu.dot_dimension_numbers<[1], [0], [0], [1], [0, 0, 1, 1], [], []>} : vector<128x4xbf16>, vector<4x128xbf16>, vector<128x128xf32> -> vector<128x128xf32>
    %c0_i32_5 = arith.constant 0 : i32
    %9 = arith.addi %0, %c0_i32_5 : i32
    %10 = tpu.assume_multiple %9, 16 : i32
    %c0_6 = arith.constant 0 : index
    %c1 = arith.constant 1 : index
    %11 = arith.index_cast %10 : i32 to index
    %c0_7 = arith.constant 0 : index
    %12 = vector.load %arg2[%c0_6, %c1, %11, %c0_7] : memref<1x6x144x4xbf16, #tpu.memory_space<vmem>>, vector<1x1x128x4xbf16>
    %13 = vector.shape_cast %12 : vector<1x1x128x4xbf16> to vector<128x4xbf16>
    %c1_8 = arith.constant 1 : index
    %c0_9 = arith.constant 0 : index
    %c0_10 = arith.constant 0 : index
    %14 = vector.load %arg3[%c1_8, %c0_9, %c0_10] : memref<9x4x128xbf16, #tpu.memory_space<vmem>>, vector<1x4x128xbf16>
    %15 = vector.shape_cast %14 : vector<1x4x128xbf16> to vector<4x128xbf16>
    %cst_11 = arith.constant dense<0.000000e+00> : vector<128x128xf32>
    %16 = tpu.matmul %13, %15, %cst_11 {dimension_numbers = #tpu.dot_dimension_numbers<[1], [0], [0], [1], [0, 0, 1, 1], [], []>} : vector<128x4xbf16>, vector<4x128xbf16>, vector<128x128xf32> -> vector<128x128xf32>
    %17 = arith.addf %8, %16 : vector<128x128xf32>
    %c0_i32_12 = arith.constant 0 : i32
    %18 = arith.addi %0, %c0_i32_12 : i32
    %19 = tpu.assume_multiple %18, 16 : i32
    %c0_13 = arith.constant 0 : index
    %c2 = arith.constant 2 : index
    %20 = arith.index_cast %19 : i32 to index
    %c0_14 = arith.constant 0 : index
    %21 = vector.load %arg2[%c0_13, %c2, %20, %c0_14] : memref<1x6x144x4xbf16, #tpu.memory_space<vmem>>, vector<1x1x128x4xbf16>
    %22 = vector.shape_cast %21 : vector<1x1x128x4xbf16> to vector<128x4xbf16>
    %c2_15 = arith.constant 2 : index
    %c0_16 = arith.constant 0 : index
    %c0_17 = arith.constant 0 : index
    %23 = vector.load %arg3[%c2_15, %c0_16, %c0_17] : memref<9x4x128xbf16, #tpu.memory_space<vmem>>, vector<1x4x128xbf16>
    %24 = vector.shape_cast %23 : vector<1x4x128xbf16> to vector<4x128xbf16>
    %cst_18 = arith.constant dense<0.000000e+00> : vector<128x128xf32>
    %25 = tpu.matmul %22, %24, %cst_18 {dimension_numbers = #tpu.dot_dimension_numbers<[1], [0], [0], [1], [0, 0, 1, 1], [], []>} : vector<128x4xbf16>, vector<4x128xbf16>, vector<128x128xf32> -> vector<128x128xf32>
    %26 = arith.addf %17, %25 : vector<128x128xf32>
    %c0_i32_19 = arith.constant 0 : i32
    %27 = arith.addi %0, %c0_i32_19 : i32
    %28 = tpu.assume_multiple %27, 16 : i32
    %c0_20 = arith.constant 0 : index
    %c3 = arith.constant 3 : index
    %29 = arith.index_cast %28 : i32 to index
    %c0_21 = arith.constant 0 : index
    %30 = vector.load %arg2[%c0_20, %c3, %29, %c0_21] : memref<1x6x144x4xbf16, #tpu.memory_space<vmem>>, vector<1x1x128x4xbf16>
    %31 = vector.shape_cast %30 : vector<1x1x128x4xbf16> to vector<128x4xbf16>
    %c3_22 = arith.constant 3 : index
    %c0_23 = arith.constant 0 : index
    %c0_24 = arith.constant 0 : index
    %32 = vector.load %arg3[%c3_22, %c0_23, %c0_24] : memref<9x4x128xbf16, #tpu.memory_space<vmem>>, vector<1x4x128xbf16>
    %33 = vector.shape_cast %32 : vector<1x4x128xbf16> to vector<4x128xbf16>
    %cst_25 = arith.constant dense<0.000000e+00> : vector<128x128xf32>
    %34 = tpu.matmul %31, %33, %cst_25 {dimension_numbers = #tpu.dot_dimension_numbers<[1], [0], [0], [1], [0, 0, 1, 1], [], []>} : vector<128x4xbf16>, vector<4x128xbf16>, vector<128x128xf32> -> vector<128x128xf32>
    %35 = arith.addf %26, %34 : vector<128x128xf32>
    %c0_i32_26 = arith.constant 0 : i32
    %36 = arith.addi %0, %c0_i32_26 : i32
    %37 = tpu.assume_multiple %36, 16 : i32
    %c0_27 = arith.constant 0 : index
    %c4 = arith.constant 4 : index
    %38 = arith.index_cast %37 : i32 to index
    %c0_28 = arith.constant 0 : index
    %39 = vector.load %arg2[%c0_27, %c4, %38, %c0_28] : memref<1x6x144x4xbf16, #tpu.memory_space<vmem>>, vector<1x1x128x4xbf16>
    %40 = vector.shape_cast %39 : vector<1x1x128x4xbf16> to vector<128x4xbf16>
    %c4_29 = arith.constant 4 : index
    %c0_30 = arith.constant 0 : index
    %c0_31 = arith.constant 0 : index
    %41 = vector.load %arg3[%c4_29, %c0_30, %c0_31] : memref<9x4x128xbf16, #tpu.memory_space<vmem>>, vector<1x4x128xbf16>
    %42 = vector.shape_cast %41 : vector<1x4x128xbf16> to vector<4x128xbf16>
    %cst_32 = arith.constant dense<0.000000e+00> : vector<128x128xf32>
    %43 = tpu.matmul %40, %42, %cst_32 {dimension_numbers = #tpu.dot_dimension_numbers<[1], [0], [0], [1], [0, 0, 1, 1], [], []>} : vector<128x4xbf16>, vector<4x128xbf16>, vector<128x128xf32> -> vector<128x128xf32>
    %44 = arith.addf %35, %43 : vector<128x128xf32>
    %c0_i32_33 = arith.constant 0 : i32
    %45 = arith.addi %0, %c0_i32_33 : i32
    %46 = tpu.assume_multiple %45, 16 : i32
    %c0_34 = arith.constant 0 : index
    %c5 = arith.constant 5 : index
    %47 = arith.index_cast %46 : i32 to index
    %c0_35 = arith.constant 0 : index
    %48 = vector.load %arg2[%c0_34, %c5, %47, %c0_35] : memref<1x6x144x4xbf16, #tpu.memory_space<vmem>>, vector<1x1x128x4xbf16>
    %49 = vector.shape_cast %48 : vector<1x1x128x4xbf16> to vector<128x4xbf16>
    %c5_36 = arith.constant 5 : index
    %c0_37 = arith.constant 0 : index
    %c0_38 = arith.constant 0 : index
    %50 = vector.load %arg3[%c5_36, %c0_37, %c0_38] : memref<9x4x128xbf16, #tpu.memory_space<vmem>>, vector<1x4x128xbf16>
    %51 = vector.shape_cast %50 : vector<1x4x128xbf16> to vector<4x128xbf16>
    %cst_39 = arith.constant dense<0.000000e+00> : vector<128x128xf32>
    %52 = tpu.matmul %49, %51, %cst_39 {dimension_numbers = #tpu.dot_dimension_numbers<[1], [0], [0], [1], [0, 0, 1, 1], [], []>} : vector<128x4xbf16>, vector<4x128xbf16>, vector<128x128xf32> -> vector<128x128xf32>
    %53 = arith.addf %44, %52 : vector<128x128xf32>
    %c16_i32 = arith.constant 16 : i32
    %54 = arith.addi %0, %c16_i32 : i32
    %55 = tpu.assume_multiple %54, 16 : i32
    %c0_40 = arith.constant 0 : index
    %c0_41 = arith.constant 0 : index
    %56 = arith.index_cast %55 : i32 to index
    %c0_42 = arith.constant 0 : index
    %57 = vector.load %arg2[%c0_40, %c0_41, %56, %c0_42] : memref<1x6x144x4xbf16, #tpu.memory_space<vmem>>, vector<1x1x128x4xbf16>
    %58 = vector.shape_cast %57 : vector<1x1x128x4xbf16> to vector<128x4xbf16>
    %c6 = arith.constant 6 : index
    %c0_43 = arith.constant 0 : index
    %c0_44 = arith.constant 0 : index
    %59 = vector.load %arg3[%c6, %c0_43, %c0_44] : memref<9x4x128xbf16, #tpu.memory_space<vmem>>, vector<1x4x128xbf16>
    %60 = vector.shape_cast %59 : vector<1x4x128xbf16> to vector<4x128xbf16>
    %cst_45 = arith.constant dense<0.000000e+00> : vector<128x128xf32>
    %61 = tpu.matmul %58, %60, %cst_45 {dimension_numbers = #tpu.dot_dimension_numbers<[1], [0], [0], [1], [0, 0, 1, 1], [], []>} : vector<128x4xbf16>, vector<4x128xbf16>, vector<128x128xf32> -> vector<128x128xf32>
    %62 = arith.addf %53, %61 : vector<128x128xf32>
    %c16_i32_46 = arith.constant 16 : i32
    %63 = arith.addi %0, %c16_i32_46 : i32
    %64 = tpu.assume_multiple %63, 16 : i32
    %c0_47 = arith.constant 0 : index
    %c1_48 = arith.constant 1 : index
    %65 = arith.index_cast %64 : i32 to index
    %c0_49 = arith.constant 0 : index
    %66 = vector.load %arg2[%c0_47, %c1_48, %65, %c0_49] : memref<1x6x144x4xbf16, #tpu.memory_space<vmem>>, vector<1x1x128x4xbf16>
    %67 = vector.shape_cast %66 : vector<1x1x128x4xbf16> to vector<128x4xbf16>
    %c7 = arith.constant 7 : index
    %c0_50 = arith.constant 0 : index
    %c0_51 = arith.constant 0 : index
    %68 = vector.load %arg3[%c7, %c0_50, %c0_51] : memref<9x4x128xbf16, #tpu.memory_space<vmem>>, vector<1x4x128xbf16>
    %69 = vector.shape_cast %68 : vector<1x4x128xbf16> to vector<4x128xbf16>
    %cst_52 = arith.constant dense<0.000000e+00> : vector<128x128xf32>
    %70 = tpu.matmul %67, %69, %cst_52 {dimension_numbers = #tpu.dot_dimension_numbers<[1], [0], [0], [1], [0, 0, 1, 1], [], []>} : vector<128x4xbf16>, vector<4x128xbf16>, vector<128x128xf32> -> vector<128x128xf32>
    %71 = arith.addf %62, %70 : vector<128x128xf32>
    %c16_i32_53 = arith.constant 16 : i32
    %72 = arith.addi %0, %c16_i32_53 : i32
    %73 = tpu.assume_multiple %72, 16 : i32
    %c0_54 = arith.constant 0 : index
    %c2_55 = arith.constant 2 : index
    %74 = arith.index_cast %73 : i32 to index
    %c0_56 = arith.constant 0 : index
    %75 = vector.load %arg2[%c0_54, %c2_55, %74, %c0_56] : memref<1x6x144x4xbf16, #tpu.memory_space<vmem>>, vector<1x1x128x4xbf16>
    %76 = vector.shape_cast %75 : vector<1x1x128x4xbf16> to vector<128x4xbf16>
    %c8 = arith.constant 8 : index
    %c0_57 = arith.constant 0 : index
    %c0_58 = arith.constant 0 : index
    %77 = vector.load %arg3[%c8, %c0_57, %c0_58] : memref<9x4x128xbf16, #tpu.memory_space<vmem>>, vector<1x4x128xbf16>
    %78 = vector.shape_cast %77 : vector<1x4x128xbf16> to vector<4x128xbf16>
    %cst_59 = arith.constant dense<0.000000e+00> : vector<128x128xf32>
    %79 = tpu.matmul %76, %78, %cst_59 {dimension_numbers = #tpu.dot_dimension_numbers<[1], [0], [0], [1], [0, 0, 1, 1], [], []>} : vector<128x4xbf16>, vector<4x128xbf16>, vector<128x128xf32> -> vector<128x128xf32>
    %80 = arith.addf %71, %79 : vector<128x128xf32>
    %c0_60 = arith.constant 0 : index
    %c0_61 = arith.constant 0 : index
    %81 = vector.load %arg4[%c0_60, %c0_61] : memref<1x128xf32, #tpu.memory_space<vmem>>, vector<1x128xf32>
    %82 = vector.broadcast %81 : vector<1x128xf32> to vector<128x128xf32>
    %83 = arith.addf %80, %82 : vector<128x128xf32>
    %cst_62 = arith.constant 0.000000e+00 : f32
    %84 = vector.broadcast %cst_62 : f32 to vector<128x128xf32>
    %85 = arith.maximumf %83, %84 : vector<128x128xf32>
    %86 = arith.truncf %85 : vector<128x128xf32> to vector<128x128xbf16>
    %c0_63 = arith.constant 0 : index
    %c0_64 = arith.constant 0 : index
    %c0_65 = arith.constant 0 : index
    %87 = vector.load %arg5[%c0_63, %c0_64, %c0_65] : memref<1x128x128xbf16, #tpu.memory_space<vmem>>, vector<1x128x128xbf16>
    %88 = vector.shape_cast %87 : vector<1x128x128xbf16> to vector<128x128xbf16>
    %89 = vector.shape_cast %86 : vector<128x128xbf16> to vector<1x128x128xbf16>
    tpu.vector_store %arg5[%c0_63, %c0_64, %c0_65], %89 {strides = array<i32>} : memref<1x128x128xbf16, #tpu.memory_space<vmem>>, vector<1x128x128xbf16>,
    return
  }
  func.func @transform_0(%arg0: i32, %arg1: i32) -> (i32, i32, i32, i32) {
    %c0_i32 = arith.constant 0 : i32
    %c0_i32_0 = arith.constant 0 : i32
    %c0_i32_1 = arith.constant 0 : i32
    %c0_i32_2 = arith.constant 0 : i32
    return %arg0, %c0_i32, %c0_i32_0, %c0_i32_1 : i32, i32, i32, i32
  }
  func.func @transform_1(%arg0: i32, %arg1: i32) -> (i32, i32, i32) {
    %c0_i32 = arith.constant 0 : i32
    %c0_i32_0 = arith.constant 0 : i32
    %c0_i32_1 = arith.constant 0 : i32
    %c0_i32_2 = arith.constant 0 : i32
    return %c0_i32, %c0_i32_0, %c0_i32_1 : i32, i32, i32
  }
  func.func @transform_2(%arg0: i32, %arg1: i32) -> (i32, i32) {
    %c0_i32 = arith.constant 0 : i32
    %c0_i32_0 = arith.constant 0 : i32
    %c0_i32_1 = arith.constant 0 : i32
    return %c0_i32, %c0_i32_0 : i32, i32
  }
  func.func @transform_3(%arg0: i32, %arg1: i32) -> (i32, i32, i32) {
    %c0_i32 = arith.constant 0 : i32
    %c0_i32_0 = arith.constant 0 : i32
    return %arg0, %arg1, %c0_i32 : i32, i32, i32
  }
}

module attributes {stable_mosaic.version = 11 : i64} {
  func.func @kernel(%arg0: i32, %arg1: i32, %arg2: memref<1x3x160x8xbf16, #tpu.memory_space<vmem>>, %arg3: memref<9x8x128xbf16, #tpu.memory_space<vmem>>, %arg4: memref<1x128xf32, #tpu.memory_space<vmem>>, %arg5: memref<1x128x4xbf16, #tpu.memory_space<vmem>>, %arg6: memref<4x128xbf16, #tpu.memory_space<vmem>>, %arg7: memref<1x128xf32, #tpu.memory_space<vmem>>, %arg8: memref<1x128x128xbf16, #tpu.memory_space<vmem>>) attributes {dimension_semantics = [#tpu.dimension_semantics<parallel>, #tpu.dimension_semantics<parallel>], iteration_bounds = array<i64: 2, 1>, scalar_prefetch = 0 : i64, scratch_operands = 0 : i64, tpu.core_type = #tpu.core_type<tc>, window_params = [{transform_indices = @transform_0, window_bounds = array<i64: 1, 3, 160, 8>}, {pipeline_mode = #tpu.pipeline_mode<synchronous>, transform_indices = @transform_1, window_bounds = array<i64: 9, 8, 128>}, {pipeline_mode = #tpu.pipeline_mode<synchronous>, transform_indices = @transform_2, window_bounds = array<i64: 1, 128>}, {transform_indices = @transform_3, window_bounds = array<i64: 1, 128, 4>}, {pipeline_mode = #tpu.pipeline_mode<synchronous>, transform_indices = @transform_4, window_bounds = array<i64: 4, 128>}, {pipeline_mode = #tpu.pipeline_mode<synchronous>, transform_indices = @transform_5, window_bounds = array<i64: 1, 128>}, {transform_indices = @transform_6, window_bounds = array<i64: 1, 128, 128>}]} {
    %c128_i32 = arith.constant 128 : i32
    %0 = arith.muli %arg1, %c128_i32 : i32
    %c0_i32 = arith.constant 0 : i32
    %1 = arith.addi %0, %c0_i32 : i32
    %2 = tpu.assume_multiple %1, 16 : i32
    %c0 = arith.constant 0 : index
    %c0_0 = arith.constant 0 : index
    %3 = arith.index_cast %2 : i32 to index
    %c0_1 = arith.constant 0 : index
    %4 = vector.load %arg2[%c0, %c0_0, %3, %c0_1] : memref<1x3x160x8xbf16, #tpu.memory_space<vmem>>, vector<1x1x128x8xbf16>
    %5 = vector.shape_cast %4 : vector<1x1x128x8xbf16> to vector<128x8xbf16>
    %c0_2 = arith.constant 0 : index
    %c0_3 = arith.constant 0 : index
    %c0_4 = arith.constant 0 : index
    %6 = vector.load %arg3[%c0_2, %c0_3, %c0_4] : memref<9x8x128xbf16, #tpu.memory_space<vmem>>, vector<1x8x128xbf16>
    %7 = vector.shape_cast %6 : vector<1x8x128xbf16> to vector<8x128xbf16>
    %cst = arith.constant dense<0.000000e+00> : vector<128x128xf32>
    %8 = tpu.matmul %5, %7, %cst {dimension_numbers = #tpu.dot_dimension_numbers<[1], [0], [0], [1], [0, 0, 1, 1], [], []>} : vector<128x8xbf16>, vector<8x128xbf16>, vector<128x128xf32> -> vector<128x128xf32>
    %c0_i32_5 = arith.constant 0 : i32
    %9 = arith.addi %0, %c0_i32_5 : i32
    %10 = tpu.assume_multiple %9, 16 : i32
    %c0_6 = arith.constant 0 : index
    %c1 = arith.constant 1 : index
    %11 = arith.index_cast %10 : i32 to index
    %c0_7 = arith.constant 0 : index
    %12 = vector.load %arg2[%c0_6, %c1, %11, %c0_7] : memref<1x3x160x8xbf16, #tpu.memory_space<vmem>>, vector<1x1x128x8xbf16>
    %13 = vector.shape_cast %12 : vector<1x1x128x8xbf16> to vector<128x8xbf16>
    %c1_8 = arith.constant 1 : index
    %c0_9 = arith.constant 0 : index
    %c0_10 = arith.constant 0 : index
    %14 = vector.load %arg3[%c1_8, %c0_9, %c0_10] : memref<9x8x128xbf16, #tpu.memory_space<vmem>>, vector<1x8x128xbf16>
    %15 = vector.shape_cast %14 : vector<1x8x128xbf16> to vector<8x128xbf16>
    %cst_11 = arith.constant dense<0.000000e+00> : vector<128x128xf32>
    %16 = tpu.matmul %13, %15, %cst_11 {dimension_numbers = #tpu.dot_dimension_numbers<[1], [0], [0], [1], [0, 0, 1, 1], [], []>} : vector<128x8xbf16>, vector<8x128xbf16>, vector<128x128xf32> -> vector<128x128xf32>
    %17 = arith.addf %8, %16 : vector<128x128xf32>
    %c0_i32_12 = arith.constant 0 : i32
    %18 = arith.addi %0, %c0_i32_12 : i32
    %19 = tpu.assume_multiple %18, 16 : i32
    %c0_13 = arith.constant 0 : index
    %c2 = arith.constant 2 : index
    %20 = arith.index_cast %19 : i32 to index
    %c0_14 = arith.constant 0 : index
    %21 = vector.load %arg2[%c0_13, %c2, %20, %c0_14] : memref<1x3x160x8xbf16, #tpu.memory_space<vmem>>, vector<1x1x128x8xbf16>
    %22 = vector.shape_cast %21 : vector<1x1x128x8xbf16> to vector<128x8xbf16>
    %c2_15 = arith.constant 2 : index
    %c0_16 = arith.constant 0 : index
    %c0_17 = arith.constant 0 : index
    %23 = vector.load %arg3[%c2_15, %c0_16, %c0_17] : memref<9x8x128xbf16, #tpu.memory_space<vmem>>, vector<1x8x128xbf16>
    %24 = vector.shape_cast %23 : vector<1x8x128xbf16> to vector<8x128xbf16>
    %cst_18 = arith.constant dense<0.000000e+00> : vector<128x128xf32>
    %25 = tpu.matmul %22, %24, %cst_18 {dimension_numbers = #tpu.dot_dimension_numbers<[1], [0], [0], [1], [0, 0, 1, 1], [], []>} : vector<128x8xbf16>, vector<8x128xbf16>, vector<128x128xf32> -> vector<128x128xf32>
    %26 = arith.addf %17, %25 : vector<128x128xf32>
    %c16_i32 = arith.constant 16 : i32
    %27 = arith.addi %0, %c16_i32 : i32
    %28 = tpu.assume_multiple %27, 16 : i32
    %c0_19 = arith.constant 0 : index
    %c0_20 = arith.constant 0 : index
    %29 = arith.index_cast %28 : i32 to index
    %c0_21 = arith.constant 0 : index
    %30 = vector.load %arg2[%c0_19, %c0_20, %29, %c0_21] : memref<1x3x160x8xbf16, #tpu.memory_space<vmem>>, vector<1x1x128x8xbf16>
    %31 = vector.shape_cast %30 : vector<1x1x128x8xbf16> to vector<128x8xbf16>
    %c3 = arith.constant 3 : index
    %c0_22 = arith.constant 0 : index
    %c0_23 = arith.constant 0 : index
    %32 = vector.load %arg3[%c3, %c0_22, %c0_23] : memref<9x8x128xbf16, #tpu.memory_space<vmem>>, vector<1x8x128xbf16>
    %33 = vector.shape_cast %32 : vector<1x8x128xbf16> to vector<8x128xbf16>
    %cst_24 = arith.constant dense<0.000000e+00> : vector<128x128xf32>
    %34 = tpu.matmul %31, %33, %cst_24 {dimension_numbers = #tpu.dot_dimension_numbers<[1], [0], [0], [1], [0, 0, 1, 1], [], []>} : vector<128x8xbf16>, vector<8x128xbf16>, vector<128x128xf32> -> vector<128x128xf32>
    %35 = arith.addf %26, %34 : vector<128x128xf32>
    %c16_i32_25 = arith.constant 16 : i32
    %36 = arith.addi %0, %c16_i32_25 : i32
    %37 = tpu.assume_multiple %36, 16 : i32
    %c0_26 = arith.constant 0 : index
    %c1_27 = arith.constant 1 : index
    %38 = arith.index_cast %37 : i32 to index
    %c0_28 = arith.constant 0 : index
    %39 = vector.load %arg2[%c0_26, %c1_27, %38, %c0_28] : memref<1x3x160x8xbf16, #tpu.memory_space<vmem>>, vector<1x1x128x8xbf16>
    %40 = vector.shape_cast %39 : vector<1x1x128x8xbf16> to vector<128x8xbf16>
    %c4 = arith.constant 4 : index
    %c0_29 = arith.constant 0 : index
    %c0_30 = arith.constant 0 : index
    %41 = vector.load %arg3[%c4, %c0_29, %c0_30] : memref<9x8x128xbf16, #tpu.memory_space<vmem>>, vector<1x8x128xbf16>
    %42 = vector.shape_cast %41 : vector<1x8x128xbf16> to vector<8x128xbf16>
    %cst_31 = arith.constant dense<0.000000e+00> : vector<128x128xf32>
    %43 = tpu.matmul %40, %42, %cst_31 {dimension_numbers = #tpu.dot_dimension_numbers<[1], [0], [0], [1], [0, 0, 1, 1], [], []>} : vector<128x8xbf16>, vector<8x128xbf16>, vector<128x128xf32> -> vector<128x128xf32>
    %44 = arith.addf %35, %43 : vector<128x128xf32>
    %c16_i32_32 = arith.constant 16 : i32
    %45 = arith.addi %0, %c16_i32_32 : i32
    %46 = tpu.assume_multiple %45, 16 : i32
    %c0_33 = arith.constant 0 : index
    %c2_34 = arith.constant 2 : index
    %47 = arith.index_cast %46 : i32 to index
    %c0_35 = arith.constant 0 : index
    %48 = vector.load %arg2[%c0_33, %c2_34, %47, %c0_35] : memref<1x3x160x8xbf16, #tpu.memory_space<vmem>>, vector<1x1x128x8xbf16>
    %49 = vector.shape_cast %48 : vector<1x1x128x8xbf16> to vector<128x8xbf16>
    %c5 = arith.constant 5 : index
    %c0_36 = arith.constant 0 : index
    %c0_37 = arith.constant 0 : index
    %50 = vector.load %arg3[%c5, %c0_36, %c0_37] : memref<9x8x128xbf16, #tpu.memory_space<vmem>>, vector<1x8x128xbf16>
    %51 = vector.shape_cast %50 : vector<1x8x128xbf16> to vector<8x128xbf16>
    %cst_38 = arith.constant dense<0.000000e+00> : vector<128x128xf32>
    %52 = tpu.matmul %49, %51, %cst_38 {dimension_numbers = #tpu.dot_dimension_numbers<[1], [0], [0], [1], [0, 0, 1, 1], [], []>} : vector<128x8xbf16>, vector<8x128xbf16>, vector<128x128xf32> -> vector<128x128xf32>
    %53 = arith.addf %44, %52 : vector<128x128xf32>
    %c32_i32 = arith.constant 32 : i32
    %54 = arith.addi %0, %c32_i32 : i32
    %55 = tpu.assume_multiple %54, 16 : i32
    %c0_39 = arith.constant 0 : index
    %c0_40 = arith.constant 0 : index
    %56 = arith.index_cast %55 : i32 to index
    %c0_41 = arith.constant 0 : index
    %57 = vector.load %arg2[%c0_39, %c0_40, %56, %c0_41] : memref<1x3x160x8xbf16, #tpu.memory_space<vmem>>, vector<1x1x128x8xbf16>
    %58 = vector.shape_cast %57 : vector<1x1x128x8xbf16> to vector<128x8xbf16>
    %c6 = arith.constant 6 : index
    %c0_42 = arith.constant 0 : index
    %c0_43 = arith.constant 0 : index
    %59 = vector.load %arg3[%c6, %c0_42, %c0_43] : memref<9x8x128xbf16, #tpu.memory_space<vmem>>, vector<1x8x128xbf16>
    %60 = vector.shape_cast %59 : vector<1x8x128xbf16> to vector<8x128xbf16>
    %cst_44 = arith.constant dense<0.000000e+00> : vector<128x128xf32>
    %61 = tpu.matmul %58, %60, %cst_44 {dimension_numbers = #tpu.dot_dimension_numbers<[1], [0], [0], [1], [0, 0, 1, 1], [], []>} : vector<128x8xbf16>, vector<8x128xbf16>, vector<128x128xf32> -> vector<128x128xf32>
    %62 = arith.addf %53, %61 : vector<128x128xf32>
    %c32_i32_45 = arith.constant 32 : i32
    %63 = arith.addi %0, %c32_i32_45 : i32
    %64 = tpu.assume_multiple %63, 16 : i32
    %c0_46 = arith.constant 0 : index
    %c1_47 = arith.constant 1 : index
    %65 = arith.index_cast %64 : i32 to index
    %c0_48 = arith.constant 0 : index
    %66 = vector.load %arg2[%c0_46, %c1_47, %65, %c0_48] : memref<1x3x160x8xbf16, #tpu.memory_space<vmem>>, vector<1x1x128x8xbf16>
    %67 = vector.shape_cast %66 : vector<1x1x128x8xbf16> to vector<128x8xbf16>
    %c7 = arith.constant 7 : index
    %c0_49 = arith.constant 0 : index
    %c0_50 = arith.constant 0 : index
    %68 = vector.load %arg3[%c7, %c0_49, %c0_50] : memref<9x8x128xbf16, #tpu.memory_space<vmem>>, vector<1x8x128xbf16>
    %69 = vector.shape_cast %68 : vector<1x8x128xbf16> to vector<8x128xbf16>
    %cst_51 = arith.constant dense<0.000000e+00> : vector<128x128xf32>
    %70 = tpu.matmul %67, %69, %cst_51 {dimension_numbers = #tpu.dot_dimension_numbers<[1], [0], [0], [1], [0, 0, 1, 1], [], []>} : vector<128x8xbf16>, vector<8x128xbf16>, vector<128x128xf32> -> vector<128x128xf32>
    %71 = arith.addf %62, %70 : vector<128x128xf32>
    %c32_i32_52 = arith.constant 32 : i32
    %72 = arith.addi %0, %c32_i32_52 : i32
    %73 = tpu.assume_multiple %72, 16 : i32
    %c0_53 = arith.constant 0 : index
    %c2_54 = arith.constant 2 : index
    %74 = arith.index_cast %73 : i32 to index
    %c0_55 = arith.constant 0 : index
    %75 = vector.load %arg2[%c0_53, %c2_54, %74, %c0_55] : memref<1x3x160x8xbf16, #tpu.memory_space<vmem>>, vector<1x1x128x8xbf16>
    %76 = vector.shape_cast %75 : vector<1x1x128x8xbf16> to vector<128x8xbf16>
    %c8 = arith.constant 8 : index
    %c0_56 = arith.constant 0 : index
    %c0_57 = arith.constant 0 : index
    %77 = vector.load %arg3[%c8, %c0_56, %c0_57] : memref<9x8x128xbf16, #tpu.memory_space<vmem>>, vector<1x8x128xbf16>
    %78 = vector.shape_cast %77 : vector<1x8x128xbf16> to vector<8x128xbf16>
    %cst_58 = arith.constant dense<0.000000e+00> : vector<128x128xf32>
    %79 = tpu.matmul %76, %78, %cst_58 {dimension_numbers = #tpu.dot_dimension_numbers<[1], [0], [0], [1], [0, 0, 1, 1], [], []>} : vector<128x8xbf16>, vector<8x128xbf16>, vector<128x128xf32> -> vector<128x128xf32>
    %80 = arith.addf %71, %79 : vector<128x128xf32>
    %c0_59 = arith.constant 0 : index
    %c0_60 = arith.constant 0 : index
    %81 = vector.load %arg4[%c0_59, %c0_60] : memref<1x128xf32, #tpu.memory_space<vmem>>, vector<1x128xf32>
    %82 = vector.broadcast %81 : vector<1x128xf32> to vector<128x128xf32>
    %83 = arith.addf %80, %82 : vector<128x128xf32>
    %c0_61 = arith.constant 0 : index
    %c0_62 = arith.constant 0 : index
    %c0_63 = arith.constant 0 : index
    %84 = vector.load %arg5[%c0_61, %c0_62, %c0_63] : memref<1x128x4xbf16, #tpu.memory_space<vmem>>, vector<1x128x4xbf16>
    %85 = vector.shape_cast %84 : vector<1x128x4xbf16> to vector<128x4xbf16>
    %c0_64 = arith.constant 0 : index
    %c0_65 = arith.constant 0 : index
    %86 = vector.load %arg6[%c0_64, %c0_65] : memref<4x128xbf16, #tpu.memory_space<vmem>>, vector<4x128xbf16>
    %cst_66 = arith.constant dense<0.000000e+00> : vector<128x128xf32>
    %87 = tpu.matmul %85, %86, %cst_66 {dimension_numbers = #tpu.dot_dimension_numbers<[1], [0], [0], [1], [0, 0, 1, 1], [], []>} : vector<128x4xbf16>, vector<4x128xbf16>, vector<128x128xf32> -> vector<128x128xf32>
    %c0_67 = arith.constant 0 : index
    %c0_68 = arith.constant 0 : index
    %88 = vector.load %arg7[%c0_67, %c0_68] : memref<1x128xf32, #tpu.memory_space<vmem>>, vector<1x128xf32>
    %89 = vector.broadcast %88 : vector<1x128xf32> to vector<128x128xf32>
    %90 = arith.addf %87, %89 : vector<128x128xf32>
    %91 = arith.addf %83, %90 : vector<128x128xf32>
    %cst_69 = arith.constant 0.000000e+00 : f32
    %92 = vector.broadcast %cst_69 : f32 to vector<128x128xf32>
    %93 = arith.maximumf %91, %92 : vector<128x128xf32>
    %94 = arith.truncf %93 : vector<128x128xf32> to vector<128x128xbf16>
    %c0_70 = arith.constant 0 : index
    %c0_71 = arith.constant 0 : index
    %c0_72 = arith.constant 0 : index
    %95 = vector.load %arg8[%c0_70, %c0_71, %c0_72] : memref<1x128x128xbf16, #tpu.memory_space<vmem>>, vector<1x128x128xbf16>
    %96 = vector.shape_cast %95 : vector<1x128x128xbf16> to vector<128x128xbf16>
    %97 = vector.shape_cast %94 : vector<128x128xbf16> to vector<1x128x128xbf16>
    tpu.vector_store %arg8[%c0_70, %c0_71, %c0_72], %97 {strides = array<i32>} : memref<1x128x128xbf16, #tpu.memory_space<vmem>>, vector<1x128x128xbf16>,
    return
  }
  func.func @transform_0(%arg0: i32, %arg1: i32) -> (i32, i32, i32, i32) {
    %c0_i32 = arith.constant 0 : i32
    %c0_i32_0 = arith.constant 0 : i32
    %c0_i32_1 = arith.constant 0 : i32
    %c0_i32_2 = arith.constant 0 : i32
    return %arg0, %c0_i32, %c0_i32_0, %c0_i32_1 : i32, i32, i32, i32
  }
  func.func @transform_1(%arg0: i32, %arg1: i32) -> (i32, i32, i32) {
    %c0_i32 = arith.constant 0 : i32
    %c0_i32_0 = arith.constant 0 : i32
    %c0_i32_1 = arith.constant 0 : i32
    %c0_i32_2 = arith.constant 0 : i32
    return %c0_i32, %c0_i32_0, %c0_i32_1 : i32, i32, i32
  }
  func.func @transform_2(%arg0: i32, %arg1: i32) -> (i32, i32) {
    %c0_i32 = arith.constant 0 : i32
    %c0_i32_0 = arith.constant 0 : i32
    %c0_i32_1 = arith.constant 0 : i32
    return %c0_i32, %c0_i32_0 : i32, i32
  }
  func.func @transform_3(%arg0: i32, %arg1: i32) -> (i32, i32, i32) {
    %c0_i32 = arith.constant 0 : i32
    %c0_i32_0 = arith.constant 0 : i32
    return %arg0, %arg1, %c0_i32 : i32, i32, i32
  }
  func.func @transform_4(%arg0: i32, %arg1: i32) -> (i32, i32) {
    %c0_i32 = arith.constant 0 : i32
    %c0_i32_0 = arith.constant 0 : i32
    %c0_i32_1 = arith.constant 0 : i32
    return %c0_i32, %c0_i32_0 : i32, i32
  }
  func.func @transform_5(%arg0: i32, %arg1: i32) -> (i32, i32) {
    %c0_i32 = arith.constant 0 : i32
    %c0_i32_0 = arith.constant 0 : i32
    %c0_i32_1 = arith.constant 0 : i32
    return %c0_i32, %c0_i32_0 : i32, i32
  }
  func.func @transform_6(%arg0: i32, %arg1: i32) -> (i32, i32, i32) {
    %c0_i32 = arith.constant 0 : i32
    %c0_i32_0 = arith.constant 0 : i32
    return %arg0, %arg1, %c0_i32 : i32, i32, i32
  }
}

</mosaic_0001>

<bundles_post_ra>
// kernel: basic_block_forward.2
= control target key start
LH: loop header
LB: loop body
LE: loop exit
PB: predicated region body
PF: predicated region fallthrough
CT: control target
= control target key end

     0   :  { %s3099_s12 = smov 0   ;;  %s3101_s13 = smov 0   ;;  %s3368_s0 = inlined_call_operand.vmem [shape: bf16[2,6,144,4], index: 0, kind: input, shape index: {}]   ;;  %s3369_s1 = inlined_call_operand.vmem [shape: bf16[9,4,128], index: 1, kind: input, shape index: {}]   ;;  %s3370_s2 = inlined_call_operand.vmem [shape: f32[1,128], index: 2, kind: input, shape index: {}]   ;;  %s3371_s3 = inlined_call_operand.vmem [shape: bf16[2,128,128], index: 3, kind: output, shape index: {}]  }
   0x1   :  { %s3103_s14 = smov 0  }
   0x2 LB: > { %s25_s15 = sadd.s32 1, %s3073_s13  ;;  %p2206_p0 = scmp.ge.s32.totalorder %s3077_s14, 1  ;;  %s3077_s14 = sphi %s3103_s14, %s13_s14   ;;  %s3073_s13 = sphi %s3101_s13, %s3373_s13   ;;  %s3069_s12 = sphi %s3099_s12, %s3372_s12  }
   0x3   : > { %p27_p1 = scmp.ge.s32.totalorder %s25_s15, 2  ;;  %p151_p2 = scmp.lt.s32.totalorder %s3077_s14, 3 }
   0x5   : > { %s3375_s15 = smov (%p27_p1, %s25_s15), 0  ;;  %p152_p3 = pnand %p2206_p0, %p151_p2 }
   0x6   : > { %v2226_v0 = vld [vmem:[%s3369_s1 + $0x2] sm:$0x3] (!%p152_p3)  ;;  %vm303_vm0 = vcmask (!%p152_p3), 1041408   ;;  %v3123_v1 = vld [vmem:[%s3369_s1 + $0x8] sm:$0x3] (!%p152_p3)  ;;  %p179_p4 = scmp.lt.s32.totalorder (!%p152_p3), %s3069_s12, 1 }
   0x7   : > { %155 = sbr.rel (%p152_p3) target bundleno = 380 (0x17c), region = 32  ;;  %2948 = vmatprep.subr.msk.bf16.mxu1 (!%p152_p3), %vm303_vm0, %v2226_v0  ;;  %2952 = vmatprep.subr.msk.bf16.mxu0 (!%p152_p3), %vm303_vm0, %v3123_v1  ;;  %v305_v2 = vsel (!%p152_p3), %vm303_vm0, %v2226_v0, 0  ;;  %v3131_v3 = vsel (!%p152_p3), %vm303_vm0, %v3123_v1, 0  ;;  %v216_v4 = vld [vmem:[%s3369_s1] sm:$0x3] (!%p152_p3)  ;;  %vm278_vm1 = vcmask (!%p152_p3), 31744  }
   0x8   : > { %2657 = vmatpush3.bf16.msra.mxu1 (!%p152_p3), %v305_v2  ;;  %2729 = vmatpush3.bf16.msra.mxu0 (!%p152_p3), %v3131_v3  ;;  %v2374_v5 = vld [vmem:[%s3369_s1 + $0xa] sm:$0x3] (!%p152_p3)  ;;  %v469_v9 = vsel (!%p152_p3), %vm303_vm0, %v216_v4, 0  ;;  %v2407_v10 = vld [vmem:[%s3369_s1 + $0xc] sm:$0x3] (!%p152_p3) }
   0x9   : > { %2949 = vmatprep.subr.msk.bf16.mxu1 (!%p152_p3), %vm303_vm0, %v216_v4  ;;  %2954 = vmatprep.subr.msk.bf16.mxu0 (!%p152_p3), %vm303_vm0, %v2374_v5  ;;  %v1257_v12 = vsel (!%p152_p3), %vm303_vm0, %v2374_v5, 0  ;;  %v2275_v13 = vld [vmem:[%s3369_s1 + $0x4] sm:$0x3] (!%p152_p3)  ;;  %v1460_v24 = vsel (!%p152_p3), %vm303_vm0, %v2407_v10, 0  ;;  %v2441_v25 = vld [vmem:[%s3369_s1 + $0xe] sm:$0x3] (!%p152_p3) }
   0xa   : > { %v654_v33 = vsel (!%p152_p3), %vm303_vm0, %v2275_v13, 0  ;;  %v2308_v35 = vld [vmem:[%s3369_s1 + $0x6] sm:$0x3] (!%p152_p3)  ;;  %v1661_v44 = vsel (!%p152_p3), %vm303_vm0, %v2441_v25, 0  ;;  %v2475_v45 = vld [vmem:[%s3369_s1 + $0x10] sm:$0x3] (!%p152_p3) }
   0xb   : > { %v855_v53 = vsel (!%p152_p3), %vm303_vm0, %v2308_v35, 0  ;;  %v1862_v63 = vsel (!%p152_p3), %vm303_vm0, %v2475_v45, 0 }
   0xe   : > { %s3377_s12 = smov (!%p179_p4, %s3069_s12), 1 }
   0xf   : > { %s2958_s24 = smul.u32 432, %s3377_s12  ;;  %s2511_s17 = sshll.u32 %s3377_s12, 6 }
  0x10   : > { %s3337_s20 = scalar_lea.vmem %s3371_s3, %s2511_s17 }
  0x11   : > { %s3148_s27 = scalar_lea.vmem %s3368_s0, %s2958_s24 }
  0x12   : > { %v2983_v6 = vld [vmem:[%s3148_s27 + $0x48] sm:$0xff]   ;;  %v2984_v7 = vld [vmem:[%s3148_s27 + $0x120] sm:$0xff]   ;;  %v2985_v8 = vld [vmem:[%s3148_s27 + $0x50] sm:$0xff]  }
  0x13   : > { %2658 = vmatprep.mubr.msk.bf16.mxu1 %vm278_vm1, %v2983_v6  ;;  %2730 = vmatprep.mubr.msk.bf16.mxu0 %vm278_vm1, %v2984_v7  ;;  %v2986_v11 = vld [vmem:[%s3148_s27 + $0x128] sm:$0xff]   ;;  %v2987_v14 = vld [vmem:[%s3148_s27 + $0x58] sm:$0xff]   ;;  %v2988_v15 = vld [vmem:[%s3148_s27 + $0x130] sm:$0xff]  }
  0x14   : > { %2659 = vmatmul.mubr.msk.bf16.vlgmr.msra.gmra.mrb[0].mxu1 %vm278_vm1, %v2985_v8  ;;  %2731 = vmatmul.mubr.msk.bf16.vlgmr.msra.gmra.mrb[0].mxu0 %vm278_vm1, %v2986_v11  ;;  %v2989_v16 = vld [vmem:[%s3148_s27 + $0x60] sm:$0xff]   ;;  %v2990_v17 = vld [vmem:[%s3148_s27 + $0x138] sm:$0xff]   ;;  %v2991_v18 = vld [vmem:[%s3148_s27 + $0x68] sm:$0xff]  }
  0x15   : > { %2675 = vmatpush3.bf16.msra.mxu1 %v469_v9  ;;  %2747 = vmatpush3.bf16.msra.mxu0 %v1257_v12  ;;  %v2992_v19 = vld [vmem:[%s3148_s27 + $0x168] sm:$0xff]   ;;  %v2993_v20 = vld [vmem:[%s3148_s27 + $0x70] sm:$0xff]   ;;  %v2995_v22 = vld [vmem:[%s3148_s27 + $0x78] sm:$0xff]  }
  0x16   : > { %2662 = vmatprep.mubr.msk.bf16.mxu1 %vm278_vm1, %v2987_v14  ;;  %2734 = vmatprep.mubr.msk.bf16.mxu0 %vm278_vm1, %v2988_v15  ;;  %v2994_v21 = vld [vmem:[%s3148_s27 + $0x170] sm:$0xff]   ;;  %v2996_v23 = vld [vmem:[%s3148_s27 + $0x178] sm:$0xff]   ;;  %v2997_v26 = vld [vmem:[%s3148_s27 + $0x80] sm:$0xff]  }
  0x17   : > { %2955 = vmatprep.subr.msk.bf16.mxu0 %vm303_vm0, %v2407_v10  ;;  %2950 = vmatprep.subr.msk.bf16.mxu1 %vm303_vm0, %v2275_v13  ;;  %v2998_v27 = vld [vmem:[%s3148_s27 + $0x180] sm:$0xff]   ;;  %v3000_v29 = vld [vmem:[%s3148_s27 + $0x188] sm:$0xff]   ;;  %v3002_v31 = vld [vmem:[%s3148_s27 + $0x190] sm:$0xff]  }
  0x18   : > { %v2999_v28 = vld [vmem:[%s3148_s27] sm:$0xff]   ;;  %v3001_v30 = vld [vmem:[%s3148_s27 + $0x8] sm:$0xff]   ;;  %v3003_v32 = vld [vmem:[%s3148_s27 + $0x10] sm:$0xff]  }
  0x19   : > { %v3004_v34 = vld [vmem:[%s3148_s27 + $0x198] sm:$0xff]   ;;  %v3006_v37 = vld [vmem:[%s3148_s27 + $0x1a0] sm:$0xff]   ;;  %v3008_v39 = vld [vmem:[%s3148_s27 + $0x8] sm:$0xff]  }
  0x1a   : > { %v3005_v36 = vld [vmem:[%s3148_s27 + $0x18] sm:$0xff]   ;;  %v3007_v38 = vld [vmem:[%s3148_s27 + $0x20] sm:$0xff]   ;;  %v3009_v40 = vld [vmem:[%s3148_s27 + $0x28] sm:$0xff]  }
  0x1b   : > { %v3010_v41 = vld [vmem:[%s3148_s27 + $0x10] sm:$0xff]   ;;  %v3012_v43 = vld [vmem:[%s3148_s27 + $0x18] sm:$0xff]   ;;  %v3014_v47 = vld [vmem:[%s3148_s27 + $0x20] sm:$0xff]  }
  0x1c   : > { %2663 = vmatmul.mubr.msk.bf16.gmra.mrb[4].mxu1 %vm278_vm1, %v2989_v16  ;;  %2735 = vmatmul.mubr.msk.bf16.gmra.mrb[4].mxu0 %vm278_vm1, %v2990_v17  ;;  %v3011_v42 = vld [vmem:[%s3148_s27 + $0x30] sm:$0xff]   ;;  %v3013_v46 = vld [vmem:[%s3148_s27 + $0x38] sm:$0xff]   ;;  %v3016_v49 = vld [vmem:[%s3148_s27 + $0x28] sm:$0xff]  }
  0x1d   : > { %2666 = vmatprep.mubr.msk.bf16.mxu1 %vm278_vm1, %v2991_v18  ;;  %2748 = vmatprep.mubr.msk.bf16.mxu0 %vm278_vm1, %v2992_v19  ;;  %v3015_v48 = vld [vmem:[%s3148_s27 + $0x90] sm:$0xff]   ;;  %v3017_v50 = vld [vmem:[%s3148_s27 + $0x98] sm:$0xff]   ;;  %v3019_v52 = vld [vmem:[%s3148_s27 + $0xa0] sm:$0xff]  }
  0x1e   : > { %v3018_v51 = vld [vmem:[%s3148_s27 + $0x30] sm:$0xff]   ;;  %v3020_v54 = vld [vmem:[%s3148_s27 + $0x38] sm:$0xff]   ;;  %v3021_v55 = vld [vmem:[%s3148_s27 + $0xa8] sm:$0xff]  }
  0x1f   : > { %v3022_v56 = vld [vmem:[%s3148_s27 + $0x40] sm:$0xff]   ;;  %v3023_v57 = vld [vmem:[%s3148_s27 + $0xb0] sm:$0xff]   ;;  %v3025_v59 = vld [vmem:[%s3148_s27 + $0xb8] sm:$0xff]  }
  0x20   : > { %v3024_v58 = vld [vmem:[%s3148_s27 + $0x50] sm:$0xff]   ;;  %v3026_v60 = vld [vmem:[%s3148_s27 + $0x58] sm:$0xff]   ;;  %v3027_v61 = vld [vmem:[%s3148_s27 + $0xc0] sm:$0xff]  }
  0x21   : > { %v3028_v62 = vld [vmem:[%s3148_s27 + $0x60] sm:$0xff]   ;;  %v3029_v0 = vld [vmem:[%s3148_s27 + $0xc8] sm:$0xff]   ;;  %v3031_v2 = vld [vmem:[%s3148_s27 + $0xd8] sm:$0xff]  }
  0x22   : > { %v3032_v4 = vld [vmem:[%s3148_s27 + $0x70] sm:$0xff]   ;;  %v3033_v5 = vld [vmem:[%s3148_s27 + $0xe0] sm:$0xff]   ;;  %v3034_v6 = vld [vmem:[%s3148_s27 + $0x78] sm:$0xff]  }
  0x23   : > { %v3035_v7 = vld [vmem:[%s3148_s27 + $0xe8] sm:$0xff]   ;;  %v3036_v8 = vld [vmem:[%s3148_s27 + $0x80] sm:$0xff]   ;;  %v3037_v9 = vld [vmem:[%s3148_s27 + $0xf0] sm:$0xff]  }
  0x24   : > { %2667 = vmatmul.mubr.msk.bf16.gmra.mrb[8].mxu1 %vm278_vm1, %v2993_v20  ;;  %2749 = vmatmul.mubr.msk.bf16.vlgmr.msra.gmra.mrb[0].mxu0 %vm278_vm1, %v2994_v21  ;;  %v3038_v10 = vld [vmem:[%s3148_s27 + $0x88] sm:$0xff]   ;;  %v3039_v11 = vld [vmem:[%s3148_s27 + $0xf8] sm:$0xff]   ;;  %v3042_v13 = vld [vmem:[%s3148_s27 + $0xa0] sm:$0xff]  }
  0x25   : > { %2670 = vmatprep.mubr.msk.bf16.mxu1 %vm278_vm1, %v2995_v22  ;;  %2765 = vmatpush3.bf16.msra.mxu0 %v1460_v24  ;;  %v3040_v12 = vld [vmem:[%s3148_s27 + $0x98] sm:$0xff]   ;;  %v3043_v14 = vld [vmem:[%s3148_s27 + $0x108] sm:$0xff]   ;;  %v3045_v16 = vld [vmem:[%s3148_s27 + $0x110] sm:$0xff]  }
  0x26   : > { %2752 = vmatprep.mubr.msk.bf16.mxu0 %vm278_vm1, %v2996_v23  ;;  %2956 = vmatprep.subr.msk.bf16.mxu0 %vm303_vm0, %v2441_v25  ;;  %v3044_v15 = vld [vmem:[%s3148_s27 + $0xa8] sm:$0xff]   ;;  %v3046_v17 = vld [vmem:[%s3148_s27 + $0xb0] sm:$0xff]   ;;  %v3047_v18 = vld [vmem:[%s3148_s27 + $0x140] sm:$0xff]  }
  0x27   : > { %v3048_v19 = vld [vmem:[%s3148_s27 + $0xb8] sm:$0xff]   ;;  %v3049_v20 = vld [vmem:[%s3148_s27 + $0x148] sm:$0xff]   ;;  %v3050_v21 = vld [vmem:[%s3148_s27 + $0xc0] sm:$0xff]  }
  0x28   : > { %v3051_v22 = vld [vmem:[%s3148_s27 + $0x150] sm:$0xff]   ;;  %v3052_v23 = vld [vmem:[%s3148_s27 + $0xc8] sm:$0xff]   ;;  %v3053_v24 = vld [vmem:[%s3148_s27 + $0x158] sm:$0xff]  }
  0x29   : > { %v3054_v25 = vld [vmem:[%s3148_s27 + $0xd0] sm:$0xff]  }
  0x2c   : > { %2671 = vmatmul.mubr.msk.bf16.gmra.mrb[12].mxu1 %vm278_vm1, %v2997_v26  ;;  %2753 = vmatmul.mubr.msk.bf16.gmra.mrb[4].mxu0 %vm278_vm1, %v2998_v27 }
  0x2d   : > { %2676 = vmatprep.mubr.msk.bf16.mxu1 %vm278_vm1, %v2999_v28  ;;  %2756 = vmatprep.mubr.msk.bf16.mxu0 %vm278_vm1, %v3000_v29 }
  0x34   : > { %2677 = vmatmul.mubr.msk.bf16.vlgmr.msra.gmra.mrb[0].mxu1 %vm278_vm1, %v3001_v30  ;;  %2757 = vmatmul.mubr.msk.bf16.gmra.mrb[8].mxu0 %vm278_vm1, %v3002_v31 }
  0x35   : > { %2693 = vmatpush3.bf16.msra.mxu1 %v654_v33  ;;  %2680 = vmatprep.mubr.msk.bf16.mxu1 %vm278_vm1, %v3003_v32 }
  0x36   : > { %2760 = vmatprep.mubr.msk.bf16.mxu0 %vm278_vm1, %v3004_v34  ;;  %2951 = vmatprep.subr.msk.bf16.mxu1 %vm303_vm0, %v2308_v35  ;;  %v3327_v35 = vld [vmem:[%s3370_s2] ss:$0 sm:$0xff] }
  0x3c   : > { %2681 = vmatmul.mubr.msk.bf16.gmra.mrb[4].mxu1 %vm278_vm1, %v3005_v36  ;;  %2761 = vmatmul.mubr.msk.bf16.gmra.mrb[12].mxu0 %vm278_vm1, %v3006_v37 }
  0x3d   : > { %2684 = vmatprep.mubr.msk.bf16.mxu1 %vm278_vm1, %v3007_v38  ;;  %2766 = vmatprep.mubr.msk.bf16.mxu0 %vm278_vm1, %v3008_v39 }
  0x44   : > { %2685 = vmatmul.mubr.msk.bf16.gmra.mrb[8].mxu1 %vm278_vm1, %v3009_v40  ;;  %2767 = vmatmul.mubr.msk.bf16.vlgmr.msra.gmra.mrb[0].mxu0 %vm278_vm1, %v3010_v41 }
  0x45   : > { %2688 = vmatprep.mubr.msk.bf16.mxu1 %vm278_vm1, %v3011_v42  ;;  %2783 = vmatpush3.bf16.msra.mxu0 %v1661_v44 }
  0x46   : > { %2770 = vmatprep.mubr.msk.bf16.mxu0 %vm278_vm1, %v3012_v43  ;;  %2957 = vmatprep.subr.msk.bf16.mxu0 %vm303_vm0, %v2475_v45 }
  0x4c   : > { %2689 = vmatmul.mubr.msk.bf16.gmra.mrb[12].mxu1 %vm278_vm1, %v3013_v46  ;;  %2771 = vmatmul.mubr.msk.bf16.gmra.mrb[4].mxu0 %vm278_vm1, %v3014_v47 }
  0x4d   : > { %2694 = vmatprep.mubr.msk.bf16.mxu1 %vm278_vm1, %v3015_v48  ;;  %2774 = vmatprep.mubr.msk.bf16.mxu0 %vm278_vm1, %v3016_v49 }
  0x54   : > { %2695 = vmatmul.mubr.msk.bf16.vlgmr.msra.gmra.mrb[0].mxu1 %vm278_vm1, %v3017_v50  ;;  %2775 = vmatmul.mubr.msk.bf16.gmra.mrb[8].mxu0 %vm278_vm1, %v3018_v51 }
  0x55   : > { %2711 = vmatpush3.bf16.msra.mxu1 %v855_v53  ;;  %2698 = vmatprep.mubr.msk.bf16.mxu1 %vm278_vm1, %v3019_v52 }
  0x56   : > { %2778 = vmatprep.mubr.msk.bf16.mxu0 %vm278_vm1, %v3020_v54  ;;  %2953 = vmatprep.subr.msk.bf16.mxu1 %vm303_vm0, %v3123_v1  ;;  %v3030_v1 = vld [vmem:[%s3148_s27 + $0x68] sm:$0xff]  }
  0x5c   : > { %2699 = vmatmul.mubr.msk.bf16.gmra.mrb[4].mxu1 %vm278_vm1, %v3021_v55  ;;  %2779 = vmatmul.mubr.msk.bf16.gmra.mrb[12].mxu0 %vm278_vm1, %v3022_v56 }
  0x5d   : > { %2702 = vmatprep.mubr.msk.bf16.mxu1 %vm278_vm1, %v3023_v57  ;;  %2784 = vmatprep.mubr.msk.bf16.mxu0 %vm278_vm1, %v3024_v58 }
  0x64   : > { %2703 = vmatmul.mubr.msk.bf16.gmra.mrb[8].mxu1 %vm278_vm1, %v3025_v59  ;;  %2785 = vmatmul.mubr.msk.bf16.vlgmr.msra.gmra.mrb[0].mxu0 %vm278_vm1, %v3026_v60 }
  0x65   : > { %2706 = vmatprep.mubr.msk.bf16.mxu1 %vm278_vm1, %v3027_v61  ;;  %2801 = vmatpush3.bf16.msra.mxu0 %v1862_v63 }
  0x66   : > { %2788 = vmatprep.mubr.msk.bf16.mxu0 %vm278_vm1, %v3028_v62 }
  0x6c   : > { %2707 = vmatmul.mubr.msk.bf16.gmra.mrb[12].mxu1 %vm278_vm1, %v3029_v0  ;;  %2789 = vmatmul.mubr.msk.bf16.gmra.mrb[4].mxu0 %vm278_vm1, %v3030_v1 }
  0x6d   : > { %2712 = vmatprep.mubr.msk.bf16.mxu1 %vm278_vm1, %v3031_v2  ;;  %2792 = vmatprep.mubr.msk.bf16.mxu0 %vm278_vm1, %v3032_v4 }
  0x74   : > { %2713 = vmatmul.mubr.msk.bf16.vlgmr.msra.gmra.mrb[0].mxu1 %vm278_vm1, %v3033_v5  ;;  %2793 = vmatmul.mubr.msk.bf16.gmra.mrb[8].mxu0 %vm278_vm1, %v3034_v6 }
  0x75   : > { %2819 = vmatpush3.bf16.msra.mxu1 %v3131_v3  ;;  %2716 = vmatprep.mubr.msk.bf16.mxu1 %vm278_vm1, %v3035_v7  ;;  %v3041_v3 = vld [vmem:[%s3148_s27 + $0x100] sm:$0xff]  }
  0x76   : > { %2796 = vmatprep.mubr.msk.bf16.mxu0 %vm278_vm1, %v3036_v8 }
  0x7c   : > { %2717 = vmatmul.mubr.msk.bf16.gmra.mrb[4].mxu1 %vm278_vm1, %v3037_v9  ;;  %2797 = vmatmul.mubr.msk.bf16.gmra.mrb[12].mxu0 %vm278_vm1, %v3038_v10 }
  0x7d   : > { %2720 = vmatprep.mubr.msk.bf16.mxu1 %vm278_vm1, %v3039_v11  ;;  %2802 = vmatprep.mubr.msk.bf16.mxu0 %vm278_vm1, %v3040_v12 }
  0x84   : > { %2721 = vmatmul.mubr.msk.bf16.gmra.mrb[8].mxu1 %vm278_vm1, %v3041_v3  ;;  %2803 = vmatmul.mubr.msk.bf16.vlgmr.msra.gmra.mrb[0].mxu0 %vm278_vm1, %v3042_v13 }
  0x85   : > { %2724 = vmatprep.mubr.msk.bf16.mxu1 %vm278_vm1, %v3043_v14  ;;  %2806 = vmatprep.mubr.msk.bf16.mxu0 %vm278_vm1, %v3044_v15 }
  0x8c   : > { %2725 = vmatmul.mubr.msk.bf16.gmra.mrb[12].mxu1 %vm278_vm1, %v3045_v16  ;;  %2807 = vmatmul.mubr.msk.bf16.gmra.mrb[4].mxu0 %vm278_vm1, %v3046_v17 }
  0x8d   : > { %2738 = vmatprep.mubr.msk.bf16.mxu1 %vm278_vm1, %v3047_v18  ;;  %2810 = vmatprep.mubr.msk.bf16.mxu0 %vm278_vm1, %v3048_v19 }
  0x94   : > { %2739 = vmatmul.mubr.msk.bf16.vlgmr.msra.gmra.mrb[8].mxu1 %vm278_vm1, %v3049_v20  ;;  %2811 = vmatmul.mubr.msk.bf16.gmra.mrb[8].mxu0 %vm278_vm1, %v3050_v21 }
  0x95   : > { %2742 = vmatprep.mubr.msk.bf16.mxu1 %vm278_vm1, %v3051_v22  ;;  %2814 = vmatprep.mubr.msk.bf16.mxu0 %vm278_vm1, %v3052_v23 }
  0x9c   : > { %2743 = vmatmul.mubr.msk.bf16.gmra.mrb[12].mxu1 %vm278_vm1, %v3053_v24  ;;  %2815 = vmatmul.mubr.msk.bf16.gmra.mrb[12].mxu0 %vm278_vm1, %v3054_v25 }
 0x147   : > { %v2714_v26 = vpop.f32.mrb[0].mxu1 }
 0x148   : > { %v891_v27 = vpop.f32.mrb[1].mxu1 }
 0x149   : > { %v2715_v28 = vpop.f32.mrb[2].mxu1 }
 0x14a   : > { %v894_v29 = vpop.f32.mrb[3].mxu1 }
 0x14f   : > { %v2718_v30 = vpop.f32.mrb[4].mxu1 }
 0x150   : > { %v907_v31 = vpop.f32.mrb[5].mxu1 }
 0x151   : > { %v2719_v32 = vpop.f32.mrb[6].mxu1 }
 0x152   : > { %v910_v33 = vpop.f32.mrb[7].mxu1 }
 0x157   : > { %v2804_v34 = vpop.f32.mrb[0].mxu0 }
 0x158   : > { %v2820_v36 = vadd.f32 %v2804_v34, %v2714_v26  ;;  %v1898_v37 = vpop.f32.mrb[1].mxu0 }
 0x159   : > { %v2821_v38 = vadd.f32 %v1898_v37, %v891_v27  ;;  %v2805_v39 = vpop.f32.mrb[2].mxu0 }
 0x15a   : > { %v1986_v40 = vadd.f32 %v2820_v36, %v3327_v35  ;;  %v2822_v41 = vadd.f32 %v2805_v39, %v2715_v28  ;;  %v1901_v42 = vpop.f32.mrb[3].mxu0 }
 0x15b   : > { %v1984_v43 = vadd.f32 %v2821_v38, %v3327_v35  ;;  %v2823_v44 = vadd.f32 %v1901_v42, %v894_v29 }
 0x15c   : > { %v1987_v45 = vadd.f32 %v2822_v41, %v3327_v35  ;;  %v2002_v47 = vmax.f32 %v1986_v40, 0.0 }
 0x15d   : > { %v1985_v46 = vadd.f32 %v2823_v44, %v3327_v35  ;;  %v2000_v49 = vmax.f32 %v1984_v43, 0.0 }
 0x15e   : > { %v2003_v48 = vmax.f32 %v1987_v45, 0.0 }
 0x15f   : > { %v2001_v50 = vmax.f32 %v1985_v46, 0.0  ;;  %v2808_v51 = vpop.f32.mrb[4].mxu0 }
 0x160   : > { %v2536_v52 = vpack.c.bf16 %v2003_v48, %v2002_v47  ;;  %v2824_v53 = vadd.f32 %v2808_v51, %v2718_v30  ;;  %v1914_v54 = vpop.f32.mrb[5].mxu0 }
 0x161   : > { %v2531_v55 = vpack.c.bf16 %v2001_v50, %v2000_v49  ;;  %v2825_v56 = vadd.f32 %v1914_v54, %v907_v31  ;;  %v2809_v57 = vpop.f32.mrb[6].mxu0 }
 0x162   : > { %2568 = vst [vmem:[%s3337_s20 + $0x8] sm:$0xff] %v2536_v52   ;;  %v1990_v58 = vadd.f32 %v2824_v53, %v3327_v35  ;;  %v2826_v59 = vadd.f32 %v2809_v57, %v2719_v32  ;;  %v1917_v60 = vpop.f32.mrb[7].mxu0 }
 0x163   : > { %2532 = vst [vmem:[%s3337_s20] sm:$0xff] %v2531_v55   ;;  %v1988_v61 = vadd.f32 %v2825_v56, %v3327_v35  ;;  %v2827_v62 = vadd.f32 %v1917_v60, %v910_v33 }
 0x164   : > { %v1991_v63 = vadd.f32 %v2826_v59, %v3327_v35  ;;  %v2006_v1 = vmax.f32 %v1990_v58, 0.0 }
 0x165   : > { %v1989_v0 = vadd.f32 %v2827_v62, %v3327_v35  ;;  %v2004_v5 = vmax.f32 %v1988_v61, 0.0 }
 0x166   : > { %v2007_v2 = vmax.f32 %v1991_v63, 0.0 }
 0x167   : > { %v2740_v4 = vpop.f32.mrb[8].mxu1  ;;  %v2005_v6 = vmax.f32 %v1989_v0, 0.0  ;;  %v2812_v7 = vpop.f32.mrb[8].mxu0 }
 0x168   : > { %v1124_v8 = vpop.f32.mrb[9].mxu1  ;;  %v2546_v9 = vpack.c.bf16 %v2007_v2, %v2006_v1  ;;  %v2828_v10 = vadd.f32 %v2812_v7, %v2740_v4  ;;  %v1930_v11 = vpop.f32.mrb[9].mxu0 }
 0x169   : > { %v2741_v12 = vpop.f32.mrb[10].mxu1  ;;  %v2541_v3 = vpack.c.bf16 %v2005_v6, %v2004_v5  ;;  %v2829_v13 = vadd.f32 %v1930_v11, %v1124_v8  ;;  %v2813_v14 = vpop.f32.mrb[10].mxu0 }
 0x16a   : > { %v1127_v15 = vpop.f32.mrb[11].mxu1  ;;  %2570 = vst [vmem:[%s3337_s20 + $0x18] sm:$0xff] %v2546_v9   ;;  %v1994_v16 = vadd.f32 %v2828_v10, %v3327_v35  ;;  %v2830_v17 = vadd.f32 %v2813_v14, %v2741_v12  ;;  %v1933_v18 = vpop.f32.mrb[11].mxu0 }
 0x16b   : > { %2569 = vst [vmem:[%s3337_s20 + $0x10] sm:$0xff] %v2541_v3   ;;  %v1992_v19 = vadd.f32 %v2829_v13, %v3327_v35  ;;  %v2831_v20 = vadd.f32 %v1933_v18, %v1127_v15 }
 0x16c   : > { %v1995_v21 = vadd.f32 %v2830_v17, %v3327_v35  ;;  %v2010_v23 = vmax.f32 %v1994_v16, 0.0 }
 0x16d   : > { %v1993_v22 = vadd.f32 %v2831_v20, %v3327_v35  ;;  %v2008_v26 = vmax.f32 %v1992_v19, 0.0 }
 0x16e   : > { %v2011_v24 = vmax.f32 %v1995_v21, 0.0 }
 0x16f   : > { %v2744_v25 = vpop.f32.mrb[12].mxu1  ;;  %v2009_v27 = vmax.f32 %v1993_v22, 0.0  ;;  %v2816_v28 = vpop.f32.mrb[12].mxu0 }
 0x170   : > { %v1140_v29 = vpop.f32.mrb[13].mxu1  ;;  %v2556_v30 = vpack.c.bf16 %v2011_v24, %v2010_v23  ;;  %v2832_v31 = vadd.f32 %v2816_v28, %v2744_v25  ;;  %v1946_v32 = vpop.f32.mrb[13].mxu0 }
 0x171   : > { %v2745_v33 = vpop.f32.mrb[14].mxu1  ;;  %v2551_v34 = vpack.c.bf16 %v2009_v27, %v2008_v26  ;;  %v2833_v36 = vadd.f32 %v1946_v32, %v1140_v29  ;;  %v2817_v37 = vpop.f32.mrb[14].mxu0 }
 0x172   : > { %v1143_v38 = vpop.f32.mrb[15].mxu1  ;;  %2572 = vst [vmem:[%s3337_s20 + $0x28] sm:$0xff] %v2556_v30   ;;  %v1998_v39 = vadd.f32 %v2832_v31, %v3327_v35  ;;  %v2834_v40 = vadd.f32 %v2817_v37, %v2745_v33  ;;  %v1949_v41 = vpop.f32.mrb[15].mxu0 }
 0x173   : > { %2571 = vst [vmem:[%s3337_s20 + $0x20] sm:$0xff] %v2551_v34   ;;  %v1996_v42 = vadd.f32 %v2833_v36, %v3327_v35  ;;  %v2835_v43 = vadd.f32 %v1949_v41, %v1143_v38 }
 0x174   : > { %v1999_v44 = vadd.f32 %v2834_v40, %v3327_v35  ;;  %v2014_v46 = vmax.f32 %v1998_v39, 0.0 }
 0x175   : > { %v1997_v45 = vadd.f32 %v2835_v43, %v3327_v35  ;;  %v2012_v48 = vmax.f32 %v1996_v42, 0.0 }
 0x176   : > { %v2015_v47 = vmax.f32 %v1999_v44, 0.0 }
 0x177   : > { %v2013_v49 = vmax.f32 %v1997_v45, 0.0 }
 0x178   : > { %v2566_v50 = vpack.c.bf16 %v2015_v47, %v2014_v46 }
 0x179   : > { %v2561_v51 = vpack.c.bf16 %v2013_v49, %v2012_v48 }
 0x17a   : > { %2574 = vst [vmem:[%s3337_s20 + $0x38] sm:$0xff] %v2566_v50  }
 0x17b   : > { %2573 = vst [vmem:[%s3337_s20 + $0x30] sm:$0xff] %v2561_v51  }
 0x17c PF: > { %s13_s14 = sadd.s32 1, %s3077_s14   ;;  %s3372_s12 = smov %s3073_s13 }
 0x17d   : > { %p10_p5 = scmp.ge.s32.totalorder %s13_s14, 4   ;;  %s3373_s13 = smov %s3375_s15 }
 0x17f   :  { %12 = sbr.rel (!%p10_p5) target bundleno = 2 (0x2), region = 79 }

// kernel: basic_block_forward.3
= control target key start
LH: loop header
LB: loop body
LE: loop exit
PB: predicated region body
PF: predicated region fallthrough
CT: control target
= control target key end

     0   :  { %s3559_s21 = smov 0   ;;  %s3561_s22 = smov 0   ;;  %s3869_s0 = inlined_call_operand.vmem [shape: bf16[2,3,160,8], index: 0, kind: input, shape index: {}]   ;;  %s3870_s1 = inlined_call_operand.vmem [shape: bf16[9,8,128], index: 1, kind: input, shape index: {}]   ;;  %s3871_s2 = inlined_call_operand.vmem [shape: f32[1,128], index: 2, kind: input, shape index: {}]   ;;  %s3872_s3 = inlined_call_operand.vmem [shape: bf16[2,128,4], index: 3, kind: input, shape index: {}]   ;;  %s3873_s4 = inlined_call_operand.vmem [shape: bf16[4,128], index: 4, kind: input, shape index: {}]   ;;  %s3874_s5 = inlined_call_operand.vmem [shape: f32[1,128], index: 5, kind: input, shape index: {}]   ;;  %s3875_s6 = inlined_call_operand.vmem [shape: bf16[2,128,128], index: 6, kind: output, shape index: {}]  }
   0x1   :  { %s3563_s23 = smov 0  }
   0x2 LB: > { %s28_s24 = sadd.s32 1, %s3518_s22  ;;  %p2548_p0 = scmp.ge.s32.totalorder %s3522_s23, 1  ;;  %s3522_s23 = sphi %s3563_s23, %s16_s23   ;;  %s3518_s22 = sphi %s3561_s22, %s3877_s22   ;;  %s3514_s21 = sphi %s3559_s21, %s3876_s21  }
   0x3   : > { %p30_p1 = scmp.ge.s32.totalorder %s28_s24, 2  ;;  %p243_p2 = scmp.lt.s32.totalorder %s3522_s23, 3 }
   0x5   : > { %s3879_s24 = smov (%p30_p1, %s28_s24), 0  ;;  %p244_p3 = pnand %p2548_p0, %p243_p2 }
   0x6   : > { %v2570_v0 = vld [vmem:[%s3870_s1 + $0x4] sm:$0xf] (!%p244_p3)  ;;  %vm420_vm0 = vcmask (!%p244_p3), 1043456   ;;  %v2720_v1 = vld [vmem:[%s3870_s1 + $0x14] sm:$0xf] (!%p244_p3)  ;;  %p286_p4 = scmp.lt.s32.totalorder (!%p244_p3), %s3514_s21, 1 }
   0x7   : > { %247 = sbr.rel (%p244_p3) target bundleno = 398 (0x18e), region = 44  ;;  %3385 = vmatprep.subr.msk.bf16.mxu1 (!%p244_p3), %vm420_vm0, %v2570_v0  ;;  %v422_v2 = vsel (!%p244_p3), %vm420_vm0, %v2570_v0, 0  ;;  %3390 = vmatprep.subr.msk.bf16.mxu0 (!%p244_p3), %vm420_vm0, %v2720_v1  ;;  %v1376_v3 = vsel (!%p244_p3), %vm420_vm0, %v2720_v1, 0  ;;  %v333_v4 = vld [vmem:[%s3870_s1] sm:$0xf] (!%p244_p3)  ;;  %vm395_vm1 = vcmask (!%p244_p3), 64512  }
   0x8   : > { %3030 = vmatpush3.bf16.msra.mxu1 (!%p244_p3), %v422_v2  ;;  %3120 = vmatpush3.bf16.msra.mxu0 (!%p244_p3), %v1376_v3  ;;  %v2753_v5 = vld [vmem:[%s3870_s1 + $0x18] sm:$0xf] (!%p244_p3)  ;;  %v586_v9 = vsel (!%p244_p3), %vm420_vm0, %v333_v4, 0  ;;  %v2619_v10 = vld [vmem:[%s3870_s1 + $0x8] sm:$0xf] (!%p244_p3)  ;;  %vm2208_vm2 = vcmask (!%p244_p3), 1041408  }
   0x9   : > { %3386 = vmatprep.subr.msk.bf16.mxu1 (!%p244_p3), %vm420_vm0, %v333_v4  ;;  %3391 = vmatprep.subr.msk.bf16.mxu0 (!%p244_p3), %vm420_vm0, %v2753_v5  ;;  %v1579_v12 = vsel (!%p244_p3), %vm420_vm0, %v2753_v5, 0  ;;  %v2787_v13 = vld [vmem:[%s3870_s1 + $0x1c] sm:$0xf] (!%p244_p3)  ;;  %v771_v30 = vsel (!%p244_p3), %vm420_vm0, %v2619_v10, 0  ;;  %v2652_v34 = vld [vmem:[%s3870_s1 + $0xc] sm:$0xf] (!%p244_p3) }
   0xa   : > { %v1780_v32 = vsel (!%p244_p3), %vm420_vm0, %v2787_v13, 0  ;;  %v2821_v35 = vld [vmem:[%s3870_s1 + $0x20] sm:$0xf] (!%p244_p3)  ;;  %v974_v50 = vsel (!%p244_p3), %vm420_vm0, %v2652_v34, 0  ;;  %v2686_v54 = vld [vmem:[%s3870_s1 + $0x10] sm:$0xf] (!%p244_p3) }
   0xb   : > { %v1981_v52 = vsel (!%p244_p3), %vm420_vm0, %v2821_v35, 0  ;;  %v2135_v55 = vld [vmem:[%s3873_s4] sm:$0x3] (!%p244_p3)  ;;  %vm2183_vm3 = vcmask (!%p244_p3), 31744  }
   0xe   : > { %s3881_s21 = smov (!%p286_p4, %s3514_s21), 1 }
   0xf   : > { %s3395_s9 = smul.u32 240, %s3881_s21  ;;  %s2874_s10 = sshll.u32 %s3881_s21, 6 }
  0x10   : > { %s3604_s13 = scalar_lea.vmem %s3872_s3, %s2874_s10 }
  0x11   : > { %s3609_s16 = scalar_lea.vmem %s3869_s0, %s3395_s9 }
  0x12   : > { %v3420_v6 = vld [vmem:[%s3609_s16 + $0x50] sm:$0xff]   ;;  %v3421_v7 = vld [vmem:[%s3609_s16 + $0xa8] sm:$0xff]   ;;  %v3422_v8 = vld [vmem:[%s3609_s16 + $0x58] sm:$0xff]  }
  0x13   : > { %3031 = vmatprep.mubr.msk.bf16.mxu1 %vm395_vm1, %v3420_v6  ;;  %3121 = vmatprep.mubr.msk.bf16.mxu0 %vm395_vm1, %v3421_v7  ;;  %v3423_v11 = vld [vmem:[%s3609_s16 + $0xb0] sm:$0xff]   ;;  %v3424_v14 = vld [vmem:[%s3609_s16 + $0x60] sm:$0xff]   ;;  %v3425_v15 = vld [vmem:[%s3609_s16 + $0xb8] sm:$0xff]   ;;  %v1175_v6 = vsel %vm420_vm0, %v2686_v54, 0 }
  0x14   : > { %3032 = vmatmul.mubr.msk.bf16.vlgmr.msra.gmra.mrb[0].mxu1 %vm395_vm1, %v3422_v8  ;;  %3122 = vmatmul.mubr.msk.bf16.vlgmr.msra.gmra.mrb[0].mxu0 %vm395_vm1, %v3423_v11  ;;  %v3426_v16 = vld [vmem:[%s3609_s16 + $0x68] sm:$0xff]   ;;  %v3427_v17 = vld [vmem:[%s3609_s16 + $0xc0] sm:$0xff]   ;;  %v3428_v18 = vld [vmem:[%s3609_s16 + $0x70] sm:$0xff]   ;;  %v2210_v8 = vsel %vm2208_vm2, %v2135_v55, 0 }
  0x15   : > { %3048 = vmatpush3.bf16.msra.mxu1 %v586_v9  ;;  %3138 = vmatpush3.bf16.msra.mxu0 %v1579_v12  ;;  %v3429_v19 = vld [vmem:[%s3609_s16 + $0xc8] sm:$0xff]   ;;  %v3430_v20 = vld [vmem:[%s3609_s16 + $0x78] sm:$0xff]   ;;  %v3431_v21 = vld [vmem:[%s3609_s16 + $0xd0] sm:$0xff]  }
  0x16   : > { %3035 = vmatprep.mubr.msk.bf16.mxu1 %vm395_vm1, %v3424_v14  ;;  %3125 = vmatprep.mubr.msk.bf16.mxu0 %vm395_vm1, %v3425_v15  ;;  %v3432_v22 = vld [vmem:[%s3609_s16 + $0x80] sm:$0xff]   ;;  %v3433_v23 = vld [vmem:[%s3609_s16 + $0xd8] sm:$0xff]   ;;  %v3434_v24 = vld [vmem:[%s3609_s16 + $0x88] sm:$0xff]  }
  0x17   : > { %3387 = vmatprep.subr.msk.bf16.mxu1 %vm420_vm0, %v2619_v10  ;;  %3392 = vmatprep.subr.msk.bf16.mxu0 %vm420_vm0, %v2787_v13  ;;  %v3435_v25 = vld [vmem:[%s3609_s16 + $0xe0] sm:$0xff]   ;;  %v3437_v27 = vld [vmem:[%s3609_s16 + $0x10] sm:$0xff]   ;;  %v3438_v28 = vld [vmem:[%s3609_s16 + $0x8] sm:$0xff]  }
  0x18   : > { %v3436_v26 = vld [vmem:[%s3609_s16] sm:$0xff]   ;;  %v3439_v29 = vld [vmem:[%s3609_s16 + $0x18] sm:$0xff]   ;;  %v3440_v31 = vld [vmem:[%s3609_s16 + $0x10] sm:$0xff]  }
  0x19   : > { %v3441_v33 = vld [vmem:[%s3609_s16 + $0x20] sm:$0xff]   ;;  %v3442_v36 = vld [vmem:[%s3609_s16 + $0x18] sm:$0xff]   ;;  %v3443_v37 = vld [vmem:[%s3609_s16 + $0x28] sm:$0xff]  }
  0x1a   : > { %v3444_v38 = vld [vmem:[%s3609_s16 + $0x20] sm:$0xff]   ;;  %v3445_v39 = vld [vmem:[%s3609_s16 + $0x30] sm:$0xff]   ;;  %v3446_v40 = vld [vmem:[%s3609_s16 + $0x28] sm:$0xff]  }
  0x1b   : > { %v3447_v41 = vld [vmem:[%s3609_s16 + $0x38] sm:$0xff]   ;;  %v3448_v42 = vld [vmem:[%s3609_s16 + $0x30] sm:$0xff]   ;;  %v3449_v43 = vld [vmem:[%s3609_s16 + $0x40] sm:$0xff]  }
  0x1c   : > { %3036 = vmatmul.mubr.msk.bf16.gmra.mrb[4].mxu1 %vm395_vm1, %v3426_v16  ;;  %3126 = vmatmul.mubr.msk.bf16.gmra.mrb[4].mxu0 %vm395_vm1, %v3427_v17  ;;  %v3450_v44 = vld [vmem:[%s3609_s16 + $0x38] sm:$0xff]   ;;  %v3451_v45 = vld [vmem:[%s3609_s16 + $0x48] sm:$0xff]   ;;  %v3452_v46 = vld [vmem:[%s3609_s16 + $0xa0] sm:$0xff]  }
  0x1d   : > { %3039 = vmatprep.mubr.msk.bf16.mxu1 %vm395_vm1, %v3428_v18  ;;  %3129 = vmatprep.mubr.msk.bf16.mxu0 %vm395_vm1, %v3429_v19  ;;  %v3453_v47 = vld [vmem:[%s3609_s16 + $0x60] sm:$0xff]   ;;  %v3454_v48 = vld [vmem:[%s3609_s16 + $0xa8] sm:$0xff]   ;;  %v3456_v51 = vld [vmem:[%s3609_s16 + $0xb0] sm:$0xff]  }
  0x1e   : > { %v3455_v49 = vld [vmem:[%s3609_s16 + $0x68] sm:$0xff]   ;;  %v3457_v53 = vld [vmem:[%s3609_s16 + $0x70] sm:$0xff]   ;;  %v3458_v56 = vld [vmem:[%s3609_s16 + $0xb8] sm:$0xff]  }
  0x1f   : > { %v3459_v57 = vld [vmem:[%s3609_s16 + $0x78] sm:$0xff]   ;;  %v3460_v58 = vld [vmem:[%s3609_s16 + $0xc0] sm:$0xff]   ;;  %v3462_v60 = vld [vmem:[%s3609_s16 + $0xc8] sm:$0xff]  }
  0x20   : > { %v3461_v59 = vld [vmem:[%s3609_s16 + $0x80] sm:$0xff]   ;;  %v3463_v61 = vld [vmem:[%s3609_s16 + $0x88] sm:$0xff]   ;;  %v3464_v62 = vld [vmem:[%s3609_s16 + $0xd0] sm:$0xff]  }
  0x21   : > { %v3465_v63 = vld [vmem:[%s3609_s16 + $0x90] sm:$0xff]   ;;  %v3466_v0 = vld [vmem:[%s3609_s16 + $0xd8] sm:$0xff]   ;;  %v3468_v2 = vld [vmem:[%s3609_s16 + $0x8] sm:$0xff]  }
  0x22   : > { %v3467_v1 = vld [vmem:[%s3609_s16 + $0x98] sm:$0xff]   ;;  %v3469_v3 = vld [vmem:[%s3609_s16 + $0xb0] sm:$0xff]   ;;  %v3473_v9 = vld [vmem:[%s3609_s16 + $0xc0] sm:$0xff]  }
  0x23   : > { %v3470_v4 = vld [vmem:[%s3609_s16 + $0x10] sm:$0xff]   ;;  %v3471_v5 = vld [vmem:[%s3609_s16 + $0xb8] sm:$0xff]   ;;  %v3474_v10 = vld [vmem:[%s3609_s16 + $0x20] sm:$0xff]  }
  0x24   : > { %3040 = vmatmul.mubr.msk.bf16.gmra.mrb[8].mxu1 %vm395_vm1, %v3430_v20  ;;  %3130 = vmatmul.mubr.msk.bf16.gmra.mrb[8].mxu0 %vm395_vm1, %v3431_v21  ;;  %v3472_v7 = vld [vmem:[%s3609_s16 + $0x18] sm:$0xff]   ;;  %v3475_v11 = vld [vmem:[%s3609_s16 + $0xc8] sm:$0xff]   ;;  %v3477_v13 = vld [vmem:[%s3609_s16 + $0xd0] sm:$0xff]  }
  0x25   : > { %3043 = vmatprep.mubr.msk.bf16.mxu1 %vm395_vm1, %v3432_v22  ;;  %3133 = vmatprep.mubr.msk.bf16.mxu0 %vm395_vm1, %v3433_v23  ;;  %v3476_v12 = vld [vmem:[%s3609_s16 + $0x28] sm:$0xff]   ;;  %v3478_v14 = vld [vmem:[%s3609_s16 + $0x30] sm:$0xff]   ;;  %v3479_v15 = vld [vmem:[%s3609_s16 + $0xd8] sm:$0xff]  }
  0x26   : > { %v3480_v16 = vld [vmem:[%s3609_s16 + $0x38] sm:$0xff]   ;;  %v3481_v17 = vld [vmem:[%s3609_s16 + $0xe0] sm:$0xff]   ;;  %v3483_v19 = vld [vmem:[%s3609_s16 + $0xe8] sm:$0xff]  }
  0x27   : > { %v3482_v18 = vld [vmem:[%s3609_s16 + $0x40] sm:$0xff]   ;;  %v3484_v20 = vld [vmem:[%s3609_s16 + $0x58] sm:$0xff]   ;;  %v3487_v23 = vld [vmem:[%s3604_s13 + $0x8] sm:$0xff]  }
  0x28   : > { %v3485_v21 = vld [vmem:[%s3604_s13] sm:$0xff]  }
  0x29   : > { %v3486_v22 = vld [vmem:[%s3609_s16 + $0x60] sm:$0xff]  }
  0x2c   : > { %3044 = vmatmul.mubr.msk.bf16.gmra.mrb[12].mxu1 %vm395_vm1, %v3434_v24  ;;  %3134 = vmatmul.mubr.msk.bf16.gmra.mrb[12].mxu0 %vm395_vm1, %v3435_v25  ;;  %v3488_v24 = vld [vmem:[%s3609_s16 + $0x68] sm:$0xff]   ;;  %v3489_v25 = vld [vmem:[%s3604_s13 + $0x10] sm:$0xff]  }
  0x2d   : > { %3049 = vmatprep.mubr.msk.bf16.mxu1 %vm395_vm1, %v3436_v26  ;;  %3139 = vmatprep.mubr.msk.bf16.mxu0 %vm395_vm1, %v3437_v27  ;;  %v3490_v26 = vld [vmem:[%s3609_s16 + $0x70] sm:$0xff]   ;;  %v3491_v27 = vld [vmem:[%s3604_s13 + $0x18] sm:$0xff]  }
  0x34   : > { %3050 = vmatmul.mubr.msk.bf16.vlgmr.msra.gmra.mrb[0].mxu1 %vm395_vm1, %v3438_v28  ;;  %3140 = vmatmul.mubr.msk.bf16.vlgmr.msra.gmra.mrb[0].mxu0 %vm395_vm1, %v3439_v29  ;;  %v3492_v28 = vld [vmem:[%s3609_s16 + $0x78] sm:$0xff]   ;;  %v3493_v29 = vld [vmem:[%s3604_s13 + $0x20] sm:$0xff]  }
  0x35   : > { %3066 = vmatpush3.bf16.msra.mxu1 %v771_v30  ;;  %3156 = vmatpush3.bf16.msra.mxu0 %v1780_v32  ;;  %v3494_v30 = vld [vmem:[%s3609_s16 + $0x80] sm:$0xff]   ;;  %v3496_v32 = vld [vmem:[%s3609_s16 + $0x88] sm:$0xff]  }
  0x36   : > { %3053 = vmatprep.mubr.msk.bf16.mxu1 %vm395_vm1, %v3440_v31  ;;  %3143 = vmatprep.mubr.msk.bf16.mxu0 %vm395_vm1, %v3441_v33  ;;  %v3495_v31 = vld [vmem:[%s3604_s13 + $0x28] sm:$0xff]   ;;  %v3497_v33 = vld [vmem:[%s3604_s13 + $0x30] sm:$0xff]  }
  0x37   : > { %3388 = vmatprep.subr.msk.bf16.mxu1 %vm420_vm0, %v2652_v34  ;;  %3393 = vmatprep.subr.msk.bf16.mxu0 %vm420_vm0, %v2821_v35  ;;  %v3498_v34 = vld [vmem:[%s3609_s16 + $0x90] sm:$0xff]   ;;  %v3499_v35 = vld [vmem:[%s3604_s13 + $0x38] sm:$0xff]   ;;  %s3827_s16 = scalar_lea.vmem %s3875_s6, %s2874_s10 }
  0x3c   : > { %3054 = vmatmul.mubr.msk.bf16.gmra.mrb[4].mxu1 %vm395_vm1, %v3442_v36  ;;  %3144 = vmatmul.mubr.msk.bf16.gmra.mrb[4].mxu0 %vm395_vm1, %v3443_v37  ;;  %v3806_v36 = vld [vmem:[%s3871_s2] ss:$0 sm:$0xff] }
  0x3d   : > { %3057 = vmatprep.mubr.msk.bf16.mxu1 %vm395_vm1, %v3444_v38  ;;  %3147 = vmatprep.mubr.msk.bf16.mxu0 %vm395_vm1, %v3445_v39 }
  0x44   : > { %3058 = vmatmul.mubr.msk.bf16.gmra.mrb[8].mxu1 %vm395_vm1, %v3446_v40  ;;  %3148 = vmatmul.mubr.msk.bf16.gmra.mrb[8].mxu0 %vm395_vm1, %v3447_v41  ;;  %v3812_v41 = vld [vmem:[%s3874_s5] ss:$0 sm:$0xff] }
  0x45   : > { %3061 = vmatprep.mubr.msk.bf16.mxu1 %vm395_vm1, %v3448_v42  ;;  %3151 = vmatprep.mubr.msk.bf16.mxu0 %vm395_vm1, %v3449_v43 }
  0x4c   : > { %3062 = vmatmul.mubr.msk.bf16.gmra.mrb[12].mxu1 %vm395_vm1, %v3450_v44  ;;  %3152 = vmatmul.mubr.msk.bf16.gmra.mrb[12].mxu0 %vm395_vm1, %v3451_v45 }
  0x4d   : > { %3067 = vmatprep.mubr.msk.bf16.mxu1 %vm395_vm1, %v3452_v46  ;;  %3157 = vmatprep.mubr.msk.bf16.mxu0 %vm395_vm1, %v3453_v47 }
  0x54   : > { %3068 = vmatmul.mubr.msk.bf16.vlgmr.msra.gmra.mrb[0].mxu1 %vm395_vm1, %v3454_v48  ;;  %3158 = vmatmul.mubr.msk.bf16.vlgmr.msra.gmra.mrb[0].mxu0 %vm395_vm1, %v3455_v49 }
  0x55   : > { %3084 = vmatpush3.bf16.msra.mxu1 %v974_v50  ;;  %3174 = vmatpush3.bf16.msra.mxu0 %v1981_v52 }
  0x56   : > { %3071 = vmatprep.mubr.msk.bf16.mxu1 %vm395_vm1, %v3456_v51  ;;  %3161 = vmatprep.mubr.msk.bf16.mxu0 %vm395_vm1, %v3457_v53 }
  0x57   : > { %3389 = vmatprep.subr.msk.bf16.mxu1 %vm420_vm0, %v2686_v54  ;;  %3394 = vmatprep.subr.msk.bf16.mxu0 %vm2208_vm2, %v2135_v55 }
  0x5c   : > { %3072 = vmatmul.mubr.msk.bf16.gmra.mrb[4].mxu1 %vm395_vm1, %v3458_v56  ;;  %3162 = vmatmul.mubr.msk.bf16.gmra.mrb[4].mxu0 %vm395_vm1, %v3459_v57 }
  0x5d   : > { %3075 = vmatprep.mubr.msk.bf16.mxu1 %vm395_vm1, %v3460_v58  ;;  %3165 = vmatprep.mubr.msk.bf16.mxu0 %vm395_vm1, %v3461_v59 }
  0x64   : > { %3076 = vmatmul.mubr.msk.bf16.gmra.mrb[8].mxu1 %vm395_vm1, %v3462_v60  ;;  %3166 = vmatmul.mubr.msk.bf16.gmra.mrb[8].mxu0 %vm395_vm1, %v3463_v61 }
  0x65   : > { %3079 = vmatprep.mubr.msk.bf16.mxu1 %vm395_vm1, %v3464_v62  ;;  %3169 = vmatprep.mubr.msk.bf16.mxu0 %vm395_vm1, %v3465_v63 }
  0x6c   : > { %3080 = vmatmul.mubr.msk.bf16.gmra.mrb[12].mxu1 %vm395_vm1, %v3466_v0  ;;  %3170 = vmatmul.mubr.msk.bf16.gmra.mrb[12].mxu0 %vm395_vm1, %v3467_v1 }
  0x6d   : > { %3085 = vmatprep.mubr.msk.bf16.mxu1 %vm395_vm1, %v3468_v2  ;;  %3175 = vmatprep.mubr.msk.bf16.mxu0 %vm395_vm1, %v3469_v3 }
  0x74   : > { %3086 = vmatmul.mubr.msk.bf16.vlgmr.msra.gmra.mrb[0].mxu1 %vm395_vm1, %v3470_v4  ;;  %3176 = vmatmul.mubr.msk.bf16.vlgmr.msra.gmra.mrb[0].mxu0 %vm395_vm1, %v3471_v5 }
  0x75   : > { %3102 = vmatpush3.bf16.msra.mxu1 %v1175_v6  ;;  %3192 = vmatpush3.bf16.msra.mxu0 %v2210_v8 }
  0x76   : > { %3089 = vmatprep.mubr.msk.bf16.mxu1 %vm395_vm1, %v3472_v7  ;;  %3179 = vmatprep.mubr.msk.bf16.mxu0 %vm395_vm1, %v3473_v9 }
  0x7c   : > { %3090 = vmatmul.mubr.msk.bf16.gmra.mrb[4].mxu1 %vm395_vm1, %v3474_v10  ;;  %3180 = vmatmul.mubr.msk.bf16.gmra.mrb[4].mxu0 %vm395_vm1, %v3475_v11 }
  0x7d   : > { %3093 = vmatprep.mubr.msk.bf16.mxu1 %vm395_vm1, %v3476_v12  ;;  %3183 = vmatprep.mubr.msk.bf16.mxu0 %vm395_vm1, %v3477_v13 }
  0x84   : > { %3094 = vmatmul.mubr.msk.bf16.gmra.mrb[8].mxu1 %vm395_vm1, %v3478_v14  ;;  %3184 = vmatmul.mubr.msk.bf16.gmra.mrb[8].mxu0 %vm395_vm1, %v3479_v15 }
  0x85   : > { %3097 = vmatprep.mubr.msk.bf16.mxu1 %vm395_vm1, %v3480_v16  ;;  %3187 = vmatprep.mubr.msk.bf16.mxu0 %vm395_vm1, %v3481_v17 }
  0x8c   : > { %3098 = vmatmul.mubr.msk.bf16.gmra.mrb[12].mxu1 %vm395_vm1, %v3482_v18  ;;  %3188 = vmatmul.mubr.msk.bf16.gmra.mrb[12].mxu0 %vm395_vm1, %v3483_v19 }
  0x8d   : > { %3103 = vmatprep.mubr.msk.bf16.mxu1 %vm395_vm1, %v3484_v20  ;;  %3193 = vmatprep.mubr.msk.bf16.mxu0 %vm2183_vm3, %v3485_v21 }
  0x94   : > { %3104 = vmatmul.mubr.msk.bf16.vlgmr.msra.gmra.mrb[0].mxu1 %vm395_vm1, %v3486_v22  ;;  %3194 = vmatmul.mubr.msk.bf16.vlgmr.msra.gmra.mrb[0].mxu0 %vm2183_vm3, %v3487_v23 }
  0x95   : > { %3107 = vmatprep.mubr.msk.bf16.mxu1 %vm395_vm1, %v3488_v24  ;;  %3197 = vmatprep.mubr.msk.bf16.mxu0 %vm2183_vm3, %v3489_v25 }
  0x9c   : > { %3108 = vmatmul.mubr.msk.bf16.gmra.mrb[4].mxu1 %vm395_vm1, %v3490_v26  ;;  %3198 = vmatmul.mubr.msk.bf16.gmra.mrb[4].mxu0 %vm2183_vm3, %v3491_v27 }
  0x9d   : > { %3111 = vmatprep.mubr.msk.bf16.mxu1 %vm395_vm1, %v3492_v28  ;;  %3201 = vmatprep.mubr.msk.bf16.mxu0 %vm2183_vm3, %v3493_v29 }
  0xa4   : > { %3112 = vmatmul.mubr.msk.bf16.gmra.mrb[8].mxu1 %vm395_vm1, %v3494_v30  ;;  %3202 = vmatmul.mubr.msk.bf16.gmra.mrb[8].mxu0 %vm2183_vm3, %v3495_v31 }
  0xa5   : > { %3115 = vmatprep.mubr.msk.bf16.mxu1 %vm395_vm1, %v3496_v32  ;;  %3205 = vmatprep.mubr.msk.bf16.mxu0 %vm2183_vm3, %v3497_v33 }
  0xac   : > { %3116 = vmatmul.mubr.msk.bf16.gmra.mrb[12].mxu1 %vm395_vm1, %v3498_v34  ;;  %3206 = vmatmul.mubr.msk.bf16.gmra.mrb[12].mxu0 %vm2183_vm3, %v3499_v35 }
 0x167   : > { %v3105_v37 = vpop.f32.mrb[0].mxu1  ;;  %v3195_v39 = vpop.f32.mrb[0].mxu0 }
 0x168   : > { %v3209_v38 = vadd.f32 %v3105_v37, %v3806_v36  ;;  %v1211_v40 = vpop.f32.mrb[1].mxu1  ;;  %v2246_v43 = vpop.f32.mrb[1].mxu0 }
 0x169   : > { %v3212_v42 = vadd.f32 %v3806_v36, %v1211_v40  ;;  %v3106_v44 = vpop.f32.mrb[2].mxu1  ;;  %v3196_v47 = vpop.f32.mrb[2].mxu0 }
 0x16a   : > { %v3210_v45 = vadd.f32 %v3209_v38, %v3195_v39  ;;  %v3215_v46 = vadd.f32 %v3106_v44, %v3806_v36  ;;  %v1214_v48 = vpop.f32.mrb[3].mxu1  ;;  %v2249_v51 = vpop.f32.mrb[3].mxu0 }
 0x16b   : > { %v3213_v49 = vadd.f32 %v3212_v42, %v2246_v43  ;;  %v3218_v50 = vadd.f32 %v3806_v36, %v1214_v48 }
 0x16c   : > { %v3211_v52 = vadd.f32 %v3210_v45, %v3812_v41  ;;  %v3216_v53 = vadd.f32 %v3215_v46, %v3812_v41 }
 0x16d   : > { %v3214_v54 = vadd.f32 %v3213_v49, %v3812_v41  ;;  %v3219_v55 = vadd.f32 %v3218_v50, %v3812_v41 }
 0x16e   : > { %v3217_v56 = vadd.f32 %v3216_v53, %v3196_v47  ;;  %v2327_v59 = vmax.f32 %v3211_v52, 0.0 }
 0x16f   : > { %v3220_v57 = vadd.f32 %v3219_v55, %v2249_v51  ;;  %v3109_v58 = vpop.f32.mrb[4].mxu1  ;;  %v3199_v62 = vpop.f32.mrb[4].mxu0  ;;  %v2325_v0 = vmax.f32 %v3214_v54, 0.0 }
 0x170   : > { %v2328_v60 = vmax.f32 %v3217_v56, 0.0  ;;  %v3221_v61 = vadd.f32 %v3109_v58, %v3806_v36  ;;  %v1227_v63 = vpop.f32.mrb[5].mxu1  ;;  %v2262_v3 = vpop.f32.mrb[5].mxu0 }
 0x171   : > { %v2326_v1 = vmax.f32 %v3220_v57, 0.0  ;;  %v3224_v2 = vadd.f32 %v3806_v36, %v1227_v63  ;;  %v3110_v4 = vpop.f32.mrb[6].mxu1  ;;  %v3200_v8 = vpop.f32.mrb[6].mxu0 }
 0x172   : > { %v2900_v5 = vpack.c.bf16 %v2328_v60, %v2327_v59  ;;  %v3222_v6 = vadd.f32 %v3221_v61, %v3812_v41  ;;  %v3227_v7 = vadd.f32 %v3110_v4, %v3806_v36  ;;  %v1230_v9 = vpop.f32.mrb[7].mxu1  ;;  %v2265_v13 = vpop.f32.mrb[7].mxu0 }
 0x173   : > { %v2895_v10 = vpack.c.bf16 %v2326_v1, %v2325_v0  ;;  %v3225_v11 = vadd.f32 %v3224_v2, %v3812_v41  ;;  %v3230_v12 = vadd.f32 %v3806_v36, %v1230_v9 }
 0x174   : > { %2932 = vst [vmem:[%s3827_s16 + $0x8] sm:$0xff] %v2900_v5   ;;  %v3223_v14 = vadd.f32 %v3222_v6, %v3199_v62  ;;  %v3228_v15 = vadd.f32 %v3227_v7, %v3812_v41 }
 0x175   : > { %2896 = vst [vmem:[%s3827_s16] sm:$0xff] %v2895_v10   ;;  %v3226_v16 = vadd.f32 %v3225_v11, %v2262_v3  ;;  %v3231_v17 = vadd.f32 %v3230_v12, %v3812_v41 }
 0x176   : > { %v3229_v18 = vadd.f32 %v3228_v15, %v3200_v8  ;;  %v2331_v21 = vmax.f32 %v3223_v14, 0.0 }
 0x177   : > { %v3232_v19 = vadd.f32 %v3231_v17, %v2265_v13  ;;  %v3113_v20 = vpop.f32.mrb[8].mxu1  ;;  %v3203_v24 = vpop.f32.mrb[8].mxu0  ;;  %v2329_v26 = vmax.f32 %v3226_v16, 0.0 }
 0x178   : > { %v2332_v22 = vmax.f32 %v3229_v18, 0.0  ;;  %v3233_v23 = vadd.f32 %v3113_v20, %v3806_v36  ;;  %v1243_v25 = vpop.f32.mrb[9].mxu1  ;;  %v2278_v29 = vpop.f32.mrb[9].mxu0 }
 0x179   : > { %v2330_v27 = vmax.f32 %v3232_v19, 0.0  ;;  %v3236_v28 = vadd.f32 %v3806_v36, %v1243_v25  ;;  %v3114_v30 = vpop.f32.mrb[10].mxu1  ;;  %v3204_v34 = vpop.f32.mrb[10].mxu0 }
 0x17a   : > { %v2910_v31 = vpack.c.bf16 %v2332_v22, %v2331_v21  ;;  %v3234_v32 = vadd.f32 %v3233_v23, %v3812_v41  ;;  %v3239_v33 = vadd.f32 %v3114_v30, %v3806_v36  ;;  %v1246_v35 = vpop.f32.mrb[11].mxu1  ;;  %v2281_v40 = vpop.f32.mrb[11].mxu0 }
 0x17b   : > { %v2905_v37 = vpack.c.bf16 %v2330_v27, %v2329_v26  ;;  %v3237_v38 = vadd.f32 %v3236_v28, %v3812_v41  ;;  %v3242_v39 = vadd.f32 %v3806_v36, %v1246_v35 }
 0x17c   : > { %2934 = vst [vmem:[%s3827_s16 + $0x18] sm:$0xff] %v2910_v31   ;;  %v3235_v42 = vadd.f32 %v3234_v32, %v3203_v24  ;;  %v3240_v43 = vadd.f32 %v3239_v33, %v3812_v41 }
 0x17d   : > { %2933 = vst [vmem:[%s3827_s16 + $0x10] sm:$0xff] %v2905_v37   ;;  %v3238_v44 = vadd.f32 %v3237_v38, %v2278_v29  ;;  %v3243_v45 = vadd.f32 %v3242_v39, %v3812_v41 }
 0x17e   : > { %v3241_v46 = vadd.f32 %v3240_v43, %v3204_v34  ;;  %v2335_v49 = vmax.f32 %v3235_v42, 0.0 }
 0x17f   : > { %v3244_v47 = vadd.f32 %v3243_v45, %v2281_v40  ;;  %v3117_v48 = vpop.f32.mrb[12].mxu1  ;;  %v3207_v52 = vpop.f32.mrb[12].mxu0  ;;  %v2333_v54 = vmax.f32 %v3238_v44, 0.0 }
 0x180   : > { %v2336_v50 = vmax.f32 %v3241_v46, 0.0  ;;  %v3245_v51 = vadd.f32 %v3117_v48, %v3806_v36  ;;  %v1259_v53 = vpop.f32.mrb[13].mxu1  ;;  %v2294_v57 = vpop.f32.mrb[13].mxu0 }
 0x181   : > { %v2334_v55 = vmax.f32 %v3244_v47, 0.0  ;;  %v3248_v56 = vadd.f32 %v3806_v36, %v1259_v53  ;;  %v3118_v58 = vpop.f32.mrb[14].mxu1  ;;  %v3208_v62 = vpop.f32.mrb[14].mxu0 }
 0x182   : > { %v2920_v59 = vpack.c.bf16 %v2336_v50, %v2335_v49  ;;  %v3246_v60 = vadd.f32 %v3245_v51, %v3812_v41  ;;  %v3251_v61 = vadd.f32 %v3118_v58, %v3806_v36  ;;  %v1262_v63 = vpop.f32.mrb[15].mxu1  ;;  %v2297_v3 = vpop.f32.mrb[15].mxu0 }
 0x183   : > { %v2915_v0 = vpack.c.bf16 %v2334_v55, %v2333_v54  ;;  %v3249_v1 = vadd.f32 %v3248_v56, %v3812_v41  ;;  %v3254_v2 = vadd.f32 %v3806_v36, %v1262_v63 }
 0x184   : > { %2936 = vst [vmem:[%s3827_s16 + $0x28] sm:$0xff] %v2920_v59   ;;  %v3247_v4 = vadd.f32 %v3246_v60, %v3207_v52  ;;  %v3252_v5 = vadd.f32 %v3251_v61, %v3812_v41 }
 0x185   : > { %2935 = vst [vmem:[%s3827_s16 + $0x20] sm:$0xff] %v2915_v0   ;;  %v3250_v6 = vadd.f32 %v3249_v1, %v2294_v57  ;;  %v3255_v7 = vadd.f32 %v3254_v2, %v3812_v41 }
 0x186   : > { %v3253_v8 = vadd.f32 %v3252_v5, %v3208_v62  ;;  %v2339_v10 = vmax.f32 %v3247_v4, 0.0 }
 0x187   : > { %v3256_v9 = vadd.f32 %v3255_v7, %v2297_v3  ;;  %v2337_v12 = vmax.f32 %v3250_v6, 0.0 }
 0x188   : > { %v2340_v11 = vmax.f32 %v3253_v8, 0.0 }
 0x189   : > { %v2338_v13 = vmax.f32 %v3256_v9, 0.0 }
 0x18a   : > { %v2930_v14 = vpack.c.bf16 %v2340_v11, %v2339_v10 }
 0x18b   : > { %v2925_v15 = vpack.c.bf16 %v2338_v13, %v2337_v12 }
 0x18c   : > { %2938 = vst [vmem:[%s3827_s16 + $0x38] sm:$0xff] %v2930_v14  }
 0x18d   : > { %2937 = vst [vmem:[%s3827_s16 + $0x30] sm:$0xff] %v2925_v15  }
 0x18e PF: > { %s16_s23 = sadd.s32 1, %s3522_s23   ;;  %s3876_s21 = smov %s3518_s22 }
 0x18f   : > { %p13_p5 = scmp.ge.s32.totalorder %s16_s23, 4   ;;  %s3877_s22 = smov %s3879_s24 }
 0x191   :  { %15 = sbr.rel (!%p13_p5) target bundleno = 2 (0x2), region = 94 }

</bundles_post_ra>
